<compile_context>
chip_gen: v5e
topology: v5e:2x2
jax: 0.10.0
libtpu: 0.0.40
codegen_flags: <defaults>
</compile_context>

<pallas_src>
import functools

import jax
import jax.numpy as jnp
from jax.experimental import pallas as pl
from jax.experimental.pallas import tpu as pltpu

_LANES = 128
_SUBLANES = 8
_IN_EPS = 1e-5          # nn.InstanceNorm2d default eps
_LRELU_SLOPE = 0.01     # nn.LeakyReLU default negative_slope


def _round_up(v, m):
    return ((v + m - 1) // m) * m


# -----------------------------------------------------------------------------
# Fused SSEConv kernel: one grid step == `bs` batch samples, channels-first.
# -----------------------------------------------------------------------------
def _sse_fused_kernel(xcol_ref, w1_ref, b1_ref, wse_ref, w2_ref, b2_ref,
                      e0_ref, e1_ref, *, c1, c2):
    bs = xcol_ref.shape[0]
    for b in range(bs):                                       # static unroll (bs small)
        xcol = xcol_ref[b]                                    # (kkc_pad, hw) bf16

        # conv1: one im2col matmul, channels-first result.  bf16 in, f32 acc.
        acc = jnp.dot(w1_ref[...], xcol,
                      preferred_element_type=jnp.float32)     # (c1p, hw) f32
        acc = acc + b1_ref[...]                               # + bias (c1p, 1)

        # InstanceNorm2d (affine=False, biased variance) over spatial (lane) axis.
        mean = jnp.mean(acc, axis=1, keepdims=True)           # (c1p, 1)
        d = acc - mean
        var = jnp.mean(d * d, axis=1, keepdims=True)
        y = d * jax.lax.rsqrt(var + _IN_EPS)

        # LeakyReLU.
        y = jnp.where(y >= 0.0, y, _LRELU_SLOPE * y)

        # Spatial SE: 1x1 conv to 1 channel (no bias) == sublane reduction; sigmoid gate.
        s = jnp.sum(y * wse_ref[...], axis=0, keepdims=True)  # (1, hw)
        e0 = y * jax.nn.sigmoid(s)                            # (c1p, hw) f32

        # Compact channels-first store (lane axis == hw, lane-dense).
        e0_ref[b] = e0[:c1, :]

        # conv2: 1x1 conv + bias, f32, straight into the compact (c2, hw) output.
        e1 = jnp.dot(w2_ref[...], e0, preferred_element_type=jnp.float32)
        e1_ref[b] = e1[:c2, :] + b2_ref[...]


# -----------------------------------------------------------------------------
# Wrapper (module boundary glue)
# -----------------------------------------------------------------------------
def upsample_bilinear_ac(x, scale):
    """nn.Upsample(scale_factor=scale, mode='bilinear', align_corners=True), NCHW."""
    # TODO(synk): kept as XLA gather/lerp glue; no clean Pallas equivalent at these sizes.
    if scale == 1:
        return x
    n, c, h, w = x.shape
    ho, wo = int(h * scale), int(w * scale)

    def src_coords(n_in, n_out):
        if n_out == 1:
            return jnp.zeros((1,), jnp.float32)
        return jnp.arange(n_out, dtype=jnp.float32) * ((n_in - 1) / (n_out - 1))

    ys, xs = src_coords(h, ho), src_coords(w, wo)
    y0 = jnp.floor(ys).astype(jnp.int32)
    x0 = jnp.floor(xs).astype(jnp.int32)
    y1 = jnp.minimum(y0 + 1, h - 1)
    x1 = jnp.minimum(x0 + 1, w - 1)
    wy = (ys - y0.astype(jnp.float32))[None, None, :, None]
    wx = (xs - x0.astype(jnp.float32))[None, None, None, :]
    top = x[:, :, y0, :][:, :, :, x0] * (1 - wx) + x[:, :, y0, :][:, :, :, x1] * wx
    bot = x[:, :, y1, :][:, :, :, x0] * (1 - wx) + x[:, :, y1, :][:, :, :, x1] * wx
    return top * (1 - wy) + bot * wy


def _choose_samples_per_step(n, per_sample_bytes, budget_bytes):
    """Largest divisor of n fitting the VMEM budget while keeping >=2 grid steps."""
    best = 1
    for bs in range(1, n + 1):
        if n % bs != 0:
            continue
        if bs * per_sample_bytes > budget_bytes:
            continue
        if n // bs < min(2, n):      # keep >=2 grid steps when possible (v7x: 2 TCs)
            continue
        best = bs
    return best


def sse_conv_forward(x, params, *, kernel_size=3, stride=1, padding=1,
                     dilation=1, down_sample=1):
    """SSEConv.forward.  x: (N, Cin, H, W) float32 (NCHW, PyTorch layout)."""
    # TODO(synk): only stride=1 (the module default) is implemented.
    assert stride == 1
    n, cin, h, w = x.shape
    w1, b1 = params["w1"], params["b1"]          # (C1, Cin, k, k), (C1,)
    w2, b2 = params["w2"], params["b2"]          # (C2, C1, 1, 1), (C2,)
    w_se = params["w_se"]                        # (1, C1, 1, 1), no bias
    c1, c2 = w1.shape[0], w2.shape[0]
    k = kernel_size
    pad = padding * dilation                     # matches Conv2d(padding=padding*dilation)
    hout = h + 2 * pad - dilation * (k - 1)
    wout = w + 2 * pad - dilation * (k - 1)
    hw = hout * wout

    kkc = k * k * cin
    kkc_pad = _round_up(max(kkc, _LANES), _LANES)
    c1p = _round_up(max(c1, _LANES), _LANES)
    c2r = _round_up(max(c2, _SUBLANES), _SUBLANES)

    # --- wrapper-side im2col, channels-first, bf16 (cin is tiny so the k*k
    # duplication is negligible and buys lane-dense kernel loads). -------------
    x_pad = jnp.pad(x.astype(jnp.float32),
                    ((0, 0), (0, 0), (pad, pad), (pad, pad)))
    taps = []
    for kh in range(k):
        for kw in range(k):
            taps.append(x_pad[:, :, kh * dilation:kh * dilation + hout,
                              kw * dilation:kw * dilation + wout])
    xcol = jnp.stack(taps, axis=1)                       # (N, k*k, cin, hout, wout)
    xcol = xcol.reshape(n, kkc, hw)                      # rows: (kh*k+kw)*cin + c
    xcol = jnp.pad(xcol, ((0, 0), (0, kkc_pad - kkc), (0, 0))).astype(jnp.bfloat16)

    # Weights packed to match the im2col row ordering; zero-padded channels.
    w1_mat = jnp.transpose(w1, (0, 2, 3, 1)).reshape(c1, kkc)
    w1_mat = jnp.pad(w1_mat, ((0, c1p - c1), (0, kkc_pad - kkc))).astype(jnp.bfloat16)
    b1_col = jnp.pad(b1.reshape(c1, 1), ((0, c1p - c1), (0, 0))).astype(jnp.float32)
    wse_col = jnp.pad(w_se.reshape(c1, 1), ((0, c1p - c1), (0, 0))).astype(jnp.float32)
    w2_mat = jnp.pad(w2.reshape(c2, c1),
                     ((0, c2r - c2), (0, c1p - c1))).astype(jnp.float32)
    b2_col = b2.reshape(c2, 1).astype(jnp.float32)

    # --- per-step batching against a VMEM budget ------------------------------
    per_sample = ((kkc_pad * hw * 2) * 2                 # im2col block, dbl-buffered
                  + (c1 * hw * 4 + c2 * hw * 4) * 2      # output blocks, dbl-buffered
                  + 4 * c1p * hw * 4)                    # live f32 intermediates
    bs = _choose_samples_per_step(n, per_sample, budget_bytes=20 * 1024 * 1024)
    n_steps = n // bs

    kernel = functools.partial(_sse_fused_kernel, c1=c1, c2=c2)

    flops = n * (2 * c1p * kkc_pad * hw + 2 * c2r * c1p * hw + 12 * c1p * hw)
    transcendentals = n * (hw + c1p)
    bytes_accessed = (n * kkc_pad * hw * 2
                      + c1p * kkc_pad * 2 + c2r * c1p * 4 + (2 * c1p + c2) * 4
                      + n * (c1 + c2) * hw * 4)

    e0_flat, e1_flat = pl.pallas_call(
        kernel,
        grid=(n_steps,),
        in_specs=[
            pl.BlockSpec((bs, kkc_pad, hw), lambda i: (i, 0, 0)),
            pl.BlockSpec((c1p, kkc_pad), lambda i: (0, 0)),
            pl.BlockSpec((c1p, 1), lambda i: (0, 0)),
            pl.BlockSpec((c1p, 1), lambda i: (0, 0)),
            pl.BlockSpec((c2r, c1p), lambda i: (0, 0)),
            pl.BlockSpec((c2, 1), lambda i: (0, 0)),
        ],
        out_specs=(
            pl.BlockSpec((bs, c1, hw), lambda i: (i, 0, 0)),
            pl.BlockSpec((bs, c2, hw), lambda i: (i, 0, 0)),
        ),
        out_shape=(
            jax.ShapeDtypeStruct((n, c1, hw), jnp.float32),
            jax.ShapeDtypeStruct((n, c2, hw), jnp.float32),
        ),
        compiler_params=pltpu.CompilerParams(
            dimension_semantics=("parallel",),
            vmem_limit_bytes=32 * 1024 * 1024,
        ),
        cost_estimate=pl.CostEstimate(flops=int(flops),
                                      transcendentals=int(transcendentals),
                                      bytes_accessed=int(bytes_accessed)),
    )(xcol, w1_mat, b1_col, wse_col, w2_mat, b2_col)

    # Compact channels-first outputs: plain reshape back to NCHW, no slicing.
    e0 = e0_flat.reshape(n, c1, hout, wout)
    e1 = e1_flat.reshape(n, c2, hout, wout)
    e1 = upsample_bilinear_ac(e1, down_sample)
    return e0, e1


# -----------------------------------------------------------------------------
# Pure-JAX reference (for the built-in correctness check)
# -----------------------------------------------------------------------------
def _reference_forward(x, params, kernel_size, padding, dilation, down_sample):
    w1, b1 = params["w1"], params["b1"]
    w2, b2 = params["w2"], params["b2"]
    w_se = params["w_se"]
    dn = ("NCHW", "OIHW", "NCHW")
    pad = padding * dilation
    e0 = jax.lax.conv_general_dilated(
        x, w1, window_strides=(1, 1), padding=[(pad, pad), (pad, pad)],
        rhs_dilation=(dilation, dilation), dimension_numbers=dn)
    e0 = e0 + b1[None, :, None, None]
    mean = e0.mean(axis=(2, 3), keepdims=True)
    var = ((e0 - mean) ** 2).mean(axis=(2, 3), keepdims=True)
    e0 = (e0 - mean) * jax.lax.rsqrt(var + _IN_EPS)
    e0 = jnp.where(e0 >= 0, e0, _LRELU_SLOPE * e0)
    gate = jax.nn.sigmoid(jnp.sum(e0 * w_se.reshape(1, -1, 1, 1),
                                  axis=1, keepdims=True))
    e0 = e0 * gate
    e1 = jax.lax.conv_general_dilated(
        e0, w2, window_strides=(1, 1), padding=[(0, 0), (0, 0)],
        dimension_numbers=dn)
    e1 = e1 + b2[None, :, None, None]
    e1 = upsample_bilinear_ac(e1, down_sample)
    return e0, e1


# -----------------------------------------------------------------------------
if __name__ == "__main__":
    key = jax.random.PRNGKey(0)
    kx, k1, k2, k3, k4, k5 = jax.random.split(key, 6)

    N, CIN, H, W = 2, 4, 16, 16
    C1, C2 = 16, 2
    KSIZE, PAD, DIL, DOWN = 3, 1, 1, 2

    params = {
        "w1": 0.1 * jax.random.normal(k1, (C1, CIN, KSIZE, KSIZE), jnp.float32),
        "b1": 0.1 * jax.random.normal(k2, (C1,), jnp.float32),
        "w2": 0.1 * jax.random.normal(k3, (C2, C1, 1, 1), jnp.float32),
        "b2": 0.1 * jax.random.normal(k4, (C2,), jnp.float32),
        "w_se": 0.1 * jax.random.normal(k5, (1, C1, 1, 1), jnp.float32),
    }
    x = jax.random.normal(kx, (N, CIN, H, W), jnp.float32)

    fwd = jax.jit(functools.partial(sse_conv_forward, kernel_size=KSIZE,
                                    padding=PAD, dilation=DIL,
                                    down_sample=DOWN))
    e0, e1 = fwd(x, params)
    jax.block_until_ready((e0, e1))

    assert e0.shape == (N, C1, H, W), e0.shape
    assert e1.shape == (N, C2, H * DOWN, W * DOWN), e1.shape

    # Correctness check vs. a pure-JAX reference.  conv1 uses bf16 MXU inputs
    # (f32 accumulation); all normalization / gate / conv2 math is f32, so the
    # tolerance is tightened vs. the previous all-bf16 version.
    r0, r1 = _reference_forward(x, params, KSIZE, PAD, DIL, DOWN)
    err0 = float(jnp.max(jnp.abs(e0 - r0)))
    err1 = float(jnp.max(jnp.abs(e1 - r1)))
    assert err0 < 0.05 and err1 < 0.05, (err0, err1)

    print("KERNEL_OK")
</pallas_src>

<mosaic_0001>
module attributes {stable_mosaic.version = 11 : i64} {
  func.func @_sse_fused_kernel(%arg0: i32, %arg1: memref<1x128x256xbf16, #tpu.memory_space<vmem>>, %arg2: memref<128x128xbf16, #tpu.memory_space<vmem>>, %arg3: memref<128x1xf32, #tpu.memory_space<vmem>>, %arg4: memref<128x1xf32, #tpu.memory_space<vmem>>, %arg5: memref<8x128xf32, #tpu.memory_space<vmem>>, %arg6: memref<2x1xf32, #tpu.memory_space<vmem>>, %arg7: memref<1x16x256xf32, #tpu.memory_space<vmem>>, %arg8: memref<1x2x256xf32, #tpu.memory_space<vmem>>) attributes {dimension_semantics = [#tpu.dimension_semantics<parallel>], iteration_bounds = array<i64: 2>, scalar_prefetch = 0 : i64, scratch_operands = 0 : i64, tpu.core_type = #tpu.core_type<tc>, window_params = [{transform_indices = @transform_0, window_bounds = array<i64: 1, 128, 256>}, {pipeline_mode = #tpu.pipeline_mode<synchronous>, transform_indices = @transform_1, window_bounds = array<i64: 128, 128>}, {pipeline_mode = #tpu.pipeline_mode<synchronous>, transform_indices = @transform_2, window_bounds = array<i64: 128, 1>}, {pipeline_mode = #tpu.pipeline_mode<synchronous>, transform_indices = @transform_3, window_bounds = array<i64: 128, 1>}, {pipeline_mode = #tpu.pipeline_mode<synchronous>, transform_indices = @transform_4, window_bounds = array<i64: 8, 128>}, {pipeline_mode = #tpu.pipeline_mode<synchronous>, transform_indices = @transform_5, window_bounds = array<i64: 2, 1>}, {transform_indices = @transform_6, window_bounds = array<i64: 1, 16, 256>}, {transform_indices = @transform_7, window_bounds = array<i64: 1, 2, 256>}]} {
    %c0 = arith.constant 0 : index
    %c0_0 = arith.constant 0 : index
    %c0_1 = arith.constant 0 : index
    %0 = vector.load %arg1[%c0, %c0_0, %c0_1] : memref<1x128x256xbf16, #tpu.memory_space<vmem>>, vector<1x128x256xbf16>
    %1 = vector.shape_cast %0 : vector<1x128x256xbf16> to vector<128x256xbf16>
    %c0_2 = arith.constant 0 : index
    %c0_3 = arith.constant 0 : index
    %2 = vector.load %arg2[%c0_2, %c0_3] : memref<128x128xbf16, #tpu.memory_space<vmem>>, vector<128x128xbf16>
    %cst = arith.constant dense<0.000000e+00> : vector<128x256xf32>
    %3 = tpu.matmul %2, %1, %cst {dimension_numbers = #tpu.dot_dimension_numbers<[1], [0], [0], [1], [0, 0, 1, 1], [], []>} : vector<128x128xbf16>, vector<128x256xbf16>, vector<128x256xf32> -> vector<128x256xf32>
    %c0_4 = arith.constant 0 : index
    %c0_5 = arith.constant 0 : index
    %4 = vector.load %arg3[%c0_4, %c0_5] : memref<128x1xf32, #tpu.memory_space<vmem>>, vector<128x1xf32>
    %5 = vector.broadcast %4 : vector<128x1xf32> to vector<128x256xf32>
    %6 = arith.addf %3, %5 : vector<128x256xf32>
    %cst_6 = arith.constant dense<0.000000e+00> : vector<128xf32>
    %7 = vector.multi_reduction <add>, %6, %cst_6 [1] : vector<128x256xf32> to vector<128xf32>
    %8 = vector.shape_cast %7 : vector<128xf32> to vector<128x1xf32>
    %cst_7 = arith.constant 2.560000e+02 : f32
    %9 = vector.broadcast %cst_7 : f32 to vector<128x1xf32>
    %10 = arith.divf %8, %9 : vector<128x1xf32>
    %11 = vector.broadcast %10 : vector<128x1xf32> to vector<128x256xf32>
    %12 = arith.subf %6, %11 : vector<128x256xf32>
    %13 = arith.mulf %12, %12 : vector<128x256xf32>
    %cst_8 = arith.constant dense<0.000000e+00> : vector<128xf32>
    %14 = vector.multi_reduction <add>, %13, %cst_8 [1] : vector<128x256xf32> to vector<128xf32>
    %15 = vector.shape_cast %14 : vector<128xf32> to vector<128x1xf32>
    %cst_9 = arith.constant 2.560000e+02 : f32
    %16 = vector.broadcast %cst_9 : f32 to vector<128x1xf32>
    %17 = arith.divf %15, %16 : vector<128x1xf32>
    %cst_10 = arith.constant 9.99999974E-6 : f32
    %18 = vector.broadcast %cst_10 : f32 to vector<128x1xf32>
    %19 = arith.addf %17, %18 : vector<128x1xf32>
    %20 = math.rsqrt %19 : vector<128x1xf32>
    %21 = vector.broadcast %20 : vector<128x1xf32> to vector<128x256xf32>
    %22 = arith.mulf %12, %21 : vector<128x256xf32>
    %cst_11 = arith.constant 0.000000e+00 : f32
    %23 = vector.broadcast %cst_11 : f32 to vector<128x256xf32>
    %24 = arith.cmpf oge, %22, %23 : vector<128x256xf32>
    %cst_12 = arith.constant 0.00999999977 : f32
    %25 = vector.broadcast %cst_12 : f32 to vector<128x256xf32>
    %26 = arith.mulf %25, %22 : vector<128x256xf32>
    %27 = arith.select %24, %22, %26 : vector<128x256xi1>, vector<128x256xf32>
    %c0_13 = arith.constant 0 : index
    %c0_14 = arith.constant 0 : index
    %28 = vector.load %arg4[%c0_13, %c0_14] : memref<128x1xf32, #tpu.memory_space<vmem>>, vector<128x1xf32>
    %29 = vector.broadcast %28 : vector<128x1xf32> to vector<128x256xf32>
    %30 = arith.mulf %27, %29 : vector<128x256xf32>
    %cst_15 = arith.constant dense<0.000000e+00> : vector<256xf32>
    %31 = vector.multi_reduction <add>, %30, %cst_15 [0] : vector<128x256xf32> to vector<256xf32>
    %32 = vector.shape_cast %31 : vector<256xf32> to vector<1x256xf32>
    %33 = arith.negf %32 : vector<1x256xf32>
    %34 = math.exp %33 : vector<1x256xf32>
    %cst_16 = arith.constant 1.000000e+00 : f32
    %35 = vector.broadcast %cst_16 : f32 to vector<1x256xf32>
    %36 = arith.addf %35, %34 : vector<1x256xf32>
    %37 = arith.divf %35, %36 : vector<1x256xf32>
    %38 = vector.broadcast %37 : vector<1x256xf32> to vector<128x256xf32>
    %39 = arith.mulf %27, %38 : vector<128x256xf32>
    %40 = vector.extract_strided_slice %39 {offsets = [0, 0], sizes = [16, 256], strides = [1, 1]} : vector<128x256xf32> to vector<16x256xf32>
    %c0_17 = arith.constant 0 : index
    %c0_18 = arith.constant 0 : index
    %c0_19 = arith.constant 0 : index
    %41 = vector.load %arg7[%c0_17, %c0_18, %c0_19] : memref<1x16x256xf32, #tpu.memory_space<vmem>>, vector<1x16x256xf32>
    %42 = vector.shape_cast %41 : vector<1x16x256xf32> to vector<16x256xf32>
    %43 = vector.shape_cast %40 : vector<16x256xf32> to vector<1x16x256xf32>
    tpu.vector_store %arg7[%c0_17, %c0_18, %c0_19], %43 {strides = array<i32>} : memref<1x16x256xf32, #tpu.memory_space<vmem>>, vector<1x16x256xf32>,
    %c0_20 = arith.constant 0 : index
    %c0_21 = arith.constant 0 : index
    %44 = vector.load %arg5[%c0_20, %c0_21] : memref<8x128xf32, #tpu.memory_space<vmem>>, vector<8x128xf32>
    %cst_22 = arith.constant dense<0.000000e+00> : vector<8x256xf32>
    %45 = tpu.matmul %44, %39, %cst_22 {dimension_numbers = #tpu.dot_dimension_numbers<[1], [0], [0], [1], [0, 0, 1, 1], [], []>} : vector<8x128xf32>, vector<128x256xf32>, vector<8x256xf32> -> vector<8x256xf32>
    %46 = vector.extract_strided_slice %45 {offsets = [0, 0], sizes = [2, 256], strides = [1, 1]} : vector<8x256xf32> to vector<2x256xf32>
    %c0_23 = arith.constant 0 : index
    %c0_24 = arith.constant 0 : index
    %47 = vector.load %arg6[%c0_23, %c0_24] : memref<2x1xf32, #tpu.memory_space<vmem>>, vector<2x1xf32>
    %48 = vector.broadcast %47 : vector<2x1xf32> to vector<2x256xf32>
    %49 = arith.addf %46, %48 : vector<2x256xf32>
    %c0_25 = arith.constant 0 : index
    %c0_26 = arith.constant 0 : index
    %c0_27 = arith.constant 0 : index
    %50 = vector.load %arg8[%c0_25, %c0_26, %c0_27] : memref<1x2x256xf32, #tpu.memory_space<vmem>>, vector<1x2x256xf32>
    %51 = vector.shape_cast %50 : vector<1x2x256xf32> to vector<2x256xf32>
    %52 = vector.shape_cast %49 : vector<2x256xf32> to vector<1x2x256xf32>
    tpu.vector_store %arg8[%c0_25, %c0_26, %c0_27], %52 {strides = array<i32>} : memref<1x2x256xf32, #tpu.memory_space<vmem>>, vector<1x2x256xf32>,
    return
  }
  func.func @transform_0(%arg0: i32) -> (i32, i32, i32) {
    %c0_i32 = arith.constant 0 : i32
    %c0_i32_0 = arith.constant 0 : i32
    %c0_i32_1 = arith.constant 0 : i32
    return %arg0, %c0_i32, %c0_i32_0 : i32, i32, i32
  }
  func.func @transform_1(%arg0: i32) -> (i32, i32) {
    %c0_i32 = arith.constant 0 : i32
    %c0_i32_0 = arith.constant 0 : i32
    %c0_i32_1 = arith.constant 0 : i32
    return %c0_i32, %c0_i32_0 : i32, i32
  }
  func.func @transform_2(%arg0: i32) -> (i32, i32) {
    %c0_i32 = arith.constant 0 : i32
    %c0_i32_0 = arith.constant 0 : i32
    %c0_i32_1 = arith.constant 0 : i32
    return %c0_i32, %c0_i32_0 : i32, i32
  }
  func.func @transform_3(%arg0: i32) -> (i32, i32) {
    %c0_i32 = arith.constant 0 : i32
    %c0_i32_0 = arith.constant 0 : i32
    %c0_i32_1 = arith.constant 0 : i32
    return %c0_i32, %c0_i32_0 : i32, i32
  }
  func.func @transform_4(%arg0: i32) -> (i32, i32) {
    %c0_i32 = arith.constant 0 : i32
    %c0_i32_0 = arith.constant 0 : i32
    %c0_i32_1 = arith.constant 0 : i32
    return %c0_i32, %c0_i32_0 : i32, i32
  }
  func.func @transform_5(%arg0: i32) -> (i32, i32) {
    %c0_i32 = arith.constant 0 : i32
    %c0_i32_0 = arith.constant 0 : i32
    %c0_i32_1 = arith.constant 0 : i32
    return %c0_i32, %c0_i32_0 : i32, i32
  }
  func.func @transform_6(%arg0: i32) -> (i32, i32, i32) {
    %c0_i32 = arith.constant 0 : i32
    %c0_i32_0 = arith.constant 0 : i32
    %c0_i32_1 = arith.constant 0 : i32
    return %arg0, %c0_i32, %c0_i32_0 : i32, i32, i32
  }
  func.func @transform_7(%arg0: i32) -> (i32, i32, i32) {
    %c0_i32 = arith.constant 0 : i32
    %c0_i32_0 = arith.constant 0 : i32
    %c0_i32_1 = arith.constant 0 : i32
    return %arg0, %c0_i32, %c0_i32_0 : i32, i32, i32
  }
}

</mosaic_0001>

<bundles_post_ra>
// kernel: sse_conv_forward.1
= control target key start
LH: loop header
LB: loop body
LE: loop exit
PB: predicated region body
PF: predicated region fallthrough
CT: control target
= control target key end

     0   :  { %s1796_s24 = smov 0   ;;  %s2823_s0 = inlined_call_operand.vmem [shape: bf16[2,128,256], index: 0, kind: input, shape index: {}]   ;;  %s2824_s1 = inlined_call_operand.vmem [shape: bf16[128,128], index: 1, kind: input, shape index: {}]   ;;  %s2825_s2 = inlined_call_operand.vmem [shape: f32[128,1], index: 2, kind: input, shape index: {}]   ;;  %s2826_s3 = inlined_call_operand.vmem [shape: f32[128,1], index: 3, kind: input, shape index: {}]   ;;  %s2827_s4 = inlined_call_operand.vmem [shape: f32[8,128], index: 4, kind: input, shape index: {}]   ;;  %s2828_s5 = inlined_call_operand.vmem [shape: f32[2,1], index: 5, kind: input, shape index: {}]   ;;  %s2829_s6 = inlined_call_operand.vmem [shape: f32[2,16,256], index: 6, kind: output, shape index: {0}]   ;;  %s2830_s7 = inlined_call_operand.vmem [shape: f32[2,2,256], index: 7, kind: output, shape index: {1}]  }
   0x1 LB: > { %s1537_s25 = sadd.s32 4294967295, %s1752_s24   ;;  %p1541_p0 = scmp.ge.s32.totalorder %s1752_s24, 1  ;;  %s1752_s24 = sphi %s1796_s24, %s18_s24  }
   0x2   : > { %p240_p1 = scmp.lt.s32.totalorder %s1752_s24, 3 }
   0x4   : > { %p241_p2 = pnand %p1541_p0, %p240_p1 }
   0x6   : > { %244 = sbr.rel (%p241_p2) target bundleno = 757 (0x2f5), region = 44 }
   0xb   : > { %v324_v0 = vld [vmem:[%s2825_s2] sm:$0xff]  ;;  %v326_v1 = vld [vmem:[%s2825_s2 + $0x10] sm:$0xff]  ;;  %p277_p3 = scmp.lt.s32.totalorder %s1537_s25, 1  ;;  %v1754_v2 = vmov 0   ;;  %v325_v7 = vld [vmem:[%s2825_s2 + $0x8] sm:$0xff] }
   0xc   : > { %1701 = vset.pattern.permute.xlu0 %v1754_v2  ;;  %1702 = vset.pattern.permute.xlu1 %v1754_v2  ;;  %v328_v3 = vld [vmem:[%s2825_s2 + $0x20] sm:$0xff]  ;;  %v327_v15 = vld [vmem:[%s2825_s2 + $0x18] sm:$0xff]  ;;  %v330_v28 = vld [vmem:[%s2825_s2 + $0x30] sm:$0xff] }
   0xd   : > { %342 = vperm.xlu0 %1701, %v324_v0   ;;  %352 = vperm.xlu1 %1702, %v326_v1   ;;  %s2898_s25 = smov (!%p277_p3, %s1537_s25), 1  ;;  %v331_v29 = vld [vmem:[%s2825_s2 + $0x38] sm:$0xff]  ;;  %v329_v31 = vld [vmem:[%s2825_s2 + $0x28] sm:$0xff]  ;;  %v334_v44 = vld [vmem:[%s2825_s2 + $0x50] sm:$0xff] }
   0xe   : > { %1703 = vset.pattern.permute.xlu2 %v1754_v2  ;;  %s1648_s9 = sshll.u32 %s2898_s25, 7  ;;  %v333_v43 = vld [vmem:[%s2825_s2 + $0x48] sm:$0xff]  ;;  %v332_v46 = vld [vmem:[%s2825_s2 + $0x40] sm:$0xff]  ;;  %v335_v61 = vld [vmem:[%s2825_s2 + $0x58] sm:$0xff]  ;;  %s1649_s28 = sshll.u32 %s2898_s25, 5 }
   0xf   : > { %362 = vperm.xlu2 %1703, %v328_v3   ;;  %s1819_s12 = scalar_lea.vmem %s2823_s0, %s1648_s9  ;;  %v336_v58 = vld [vmem:[%s2825_s2 + $0x60] sm:$0xff]  ;;  %v337_v59 = vld [vmem:[%s2825_s2 + $0x68] sm:$0xff]  ;;  %v339_v1 = vld [vmem:[%s2825_s2 + $0x78] sm:$0xff]  ;;  %s286_s8 = scalar_lea.vmem %s2829_s6, %s1649_s28 }
  0x10   : > { %v1638_v4 = vld [vmem:[%s1819_s12 + $0x70] sm:$0xf]  ;;  %v1666_v5 = vld [vmem:[%s1819_s12 + $0x74] sm:$0xf0]  ;;  %v1665_v6 = vld [vmem:[%s1819_s12 + $0x74] sm:$0xf] }
  0x11   : > { %v1639_v8 = vor.u32 %v1666_v5, %v1638_v4  ;;  %v1640_v9 = vld [vmem:[%s1819_s12 + $0x78] sm:$0xf0]  ;;  %v1630_v10 = vld [vmem:[%s1819_s12 + $0x60] sm:$0xf]  ;;  %v1664_v11 = vld [vmem:[%s1819_s12 + $0x64] sm:$0xf0] }
  0x12   : > { %v1643_v12 = vor.u32 %v1665_v6, %v1640_v9  ;;  %v1663_v13 = vld [vmem:[%s1819_s12 + $0x64] sm:$0xf]  ;;  %v1632_v14 = vld [vmem:[%s1819_s12 + $0x68] sm:$0xf0]  ;;  %v1631_v16 = vor.u32 %v1664_v11, %v1630_v10  ;;  %v1622_v18 = vld [vmem:[%s1819_s12 + $0x50] sm:$0xf] }
  0x13   : > { %548 = vmatpush.bf16.msra.mxu0 %v1639_v8  ;;  %1675 = vmatpush.bf16.msra.mxu2 %v1639_v8  ;;  %v1635_v17 = vor.u32 %v1663_v13, %v1632_v14  ;;  %v1662_v19 = vld [vmem:[%s1819_s12 + $0x54] sm:$0xf0]  ;;  %v1661_v20 = vld [vmem:[%s1819_s12 + $0x54] sm:$0xf]  ;;  %v1624_v21 = vld [vmem:[%s1819_s12 + $0x58] sm:$0xf0] }
  0x14   : > { %597 = vmatpush.bf16.msra.mxu1 %v1643_v12  ;;  %1683 = vmatpush.bf16.msra.mxu3 %v1643_v12  ;;  %v1623_v22 = vor.u32 %v1662_v19, %v1622_v18  ;;  %v1627_v23 = vor.u32 %v1661_v20, %v1624_v21  ;;  %v1614_v24 = vld [vmem:[%s1819_s12 + $0x40] sm:$0xf]  ;;  %v1660_v25 = vld [vmem:[%s1819_s12 + $0x44] sm:$0xf0]  ;;  %v1659_v26 = vld [vmem:[%s1819_s12 + $0x44] sm:$0xf] }
  0x15   : > { %347 = vperm.xlu0 %1701, %v325_v7   ;;  %357 = vperm.xlu1 %1702, %v327_v15   ;;  %v1616_v27 = vld [vmem:[%s1819_s12 + $0x48] sm:$0xf0]  ;;  %v1615_v30 = vor.u32 %v1660_v25, %v1614_v24  ;;  %v1606_v33 = vld [vmem:[%s1819_s12 + $0x30] sm:$0xf]  ;;  %v1658_v34 = vld [vmem:[%s1819_s12 + $0x34] sm:$0xf0] }
  0x16   : > { %v1619_v32 = vor.u32 %v1659_v26, %v1616_v27  ;;  %v1657_v35 = vld [vmem:[%s1819_s12 + $0x34] sm:$0xf]  ;;  %v1608_v36 = vld [vmem:[%s1819_s12 + $0x38] sm:$0xf0]  ;;  %v1607_v37 = vor.u32 %v1658_v34, %v1606_v33  ;;  %v1598_v39 = vld [vmem:[%s1819_s12 + $0x20] sm:$0xf] }
  0x17   : > { %549 = vmatpush.bf16.msra.mxu0 %v1631_v16  ;;  %1676 = vmatpush.bf16.msra.mxu2 %v1631_v16  ;;  %v1611_v38 = vor.u32 %v1657_v35, %v1608_v36  ;;  %v1656_v40 = vld [vmem:[%s1819_s12 + $0x24] sm:$0xf0]  ;;  %v1655_v41 = vld [vmem:[%s1819_s12 + $0x24] sm:$0xf]  ;;  %v1600_v42 = vld [vmem:[%s1819_s12 + $0x28] sm:$0xf0] }
  0x18   : > { %598 = vmatpush.bf16.msra.mxu1 %v1635_v17  ;;  %1684 = vmatpush.bf16.msra.mxu3 %v1635_v17  ;;  %v1599_v45 = vor.u32 %v1656_v40, %v1598_v39  ;;  %v1603_v47 = vor.u32 %v1655_v41, %v1600_v42  ;;  %v1590_v48 = vld [vmem:[%s1819_s12 + $0x10] sm:$0xf]  ;;  %v1654_v49 = vld [vmem:[%s1819_s12 + $0x14] sm:$0xf0]  ;;  %v1653_v50 = vld [vmem:[%s1819_s12 + $0x14] sm:$0xf] }
  0x19   : > { %367 = vperm.xlu2 %1703, %v329_v31   ;;  %v1592_v51 = vld [vmem:[%s1819_s12 + $0x18] sm:$0xf0]  ;;  %v1591_v52 = vor.u32 %v1654_v49, %v1590_v48  ;;  %v1582_v54 = vld [vmem:[%s1819_s12] sm:$0xf]  ;;  %v1652_v55 = vld [vmem:[%s1819_s12 + $0x4] sm:$0xf0] }
  0x1a   : > { %v1595_v53 = vor.u32 %v1653_v50, %v1592_v51  ;;  %v1651_v56 = vld [vmem:[%s1819_s12 + $0x4] sm:$0xf]  ;;  %v1584_v57 = vld [vmem:[%s1819_s12 + $0x8] sm:$0xf0]  ;;  %v1583_v60 = vor.u32 %v1652_v55, %v1582_v54  ;;  %v1151_v2 = vld [vmem:[%s2826_s3 + $0x10] sm:$0xff]  ;;  %s1650_s11 = sshll.u32 %s2898_s25, 2 }
  0x1b   : > { %550 = vmatpush.bf16.msra.mxu0 %v1623_v22  ;;  %1677 = vmatpush.bf16.msra.mxu2 %v1623_v22  ;;  %v1587_v62 = vor.u32 %v1651_v56, %v1584_v57  ;;  %v1667_v63 = vld [vmem:[%s2824_s1] sm:$0xff]  ;;  %v1672_v0 = vld [vmem:[%s2824_s1 + $0x28] sm:$0xff]  ;;  %v338_v3 = vld [vmem:[%s2825_s2 + $0x70] sm:$0xff]  ;;  %s291_s12 = scalar_lea.vmem %s2830_s7, %s1650_s11 }
  0x1c   : > { %599 = vmatpush.bf16.msra.mxu1 %v1627_v23  ;;  %1685 = vmatpush.bf16.msra.mxu3 %v1627_v23  ;;  %v1150_v4 = vld [vmem:[%s2826_s3 + $0x8] sm:$0xff]  ;;  %v1149_v6 = vld [vmem:[%s2826_s3] sm:$0xff]  ;;  %v1673_v8 = vld [vmem:[%s2824_s1 + $0x30] sm:$0xff] }
  0x1d   : > { %372 = vperm.xlu0 %1701, %v330_v28   ;;  %377 = vperm.xlu1 %1702, %v331_v29   ;;  %v1154_v5 = vld [vmem:[%s2826_s3 + $0x28] sm:$0xff]  ;;  %v1152_v9 = vld [vmem:[%s2826_s3 + $0x18] sm:$0xff]  ;;  %v1157_v10 = vld [vmem:[%s2826_s3 + $0x40] sm:$0xff] }
  0x1e   : > { %v1668_v7 = vld [vmem:[%s2824_s1 + $0x8] sm:$0xff]  ;;  %v1153_v11 = vld [vmem:[%s2826_s3 + $0x20] sm:$0xff]  ;;  %v1155_v12 = vld [vmem:[%s2826_s3 + $0x30] sm:$0xff] }
  0x1f   : > { %551 = vmatpush.bf16.msra.mxu0 %v1615_v30  ;;  %1678 = vmatpush.bf16.msra.mxu2 %v1615_v30  ;;  %v1156_v13 = vld [vmem:[%s2826_s3 + $0x38] sm:$0xff]  ;;  %v1669_v14 = vld [vmem:[%s2824_s1 + $0x10] sm:$0xff]  ;;  %v1158_v16 = vld [vmem:[%s2826_s3 + $0x48] sm:$0xff] }
  0x20   : > { %600 = vmatpush.bf16.msra.mxu1 %v1619_v32  ;;  %1686 = vmatpush.bf16.msra.mxu3 %v1619_v32  ;;  %v1674_v15 = vld [vmem:[%s2824_s1 + $0x38] sm:$0xff]  ;;  %v1671_v18 = vld [vmem:[%s2824_s1 + $0x20] sm:$0xff] }
  0x21   : > { %382 = vperm.xlu2 %1703, %v332_v46   ;;  %v1670_v17 = vld [vmem:[%s2824_s1 + $0x18] sm:$0xff] }
  0x23   : > { %552 = vmatpush.bf16.msra.mxu0 %v1607_v37  ;;  %1679 = vmatpush.bf16.msra.mxu2 %v1607_v37 }
  0x24   : > { %601 = vmatpush.bf16.msra.mxu1 %v1611_v38  ;;  %1687 = vmatpush.bf16.msra.mxu3 %v1611_v38 }
  0x25   : > { %387 = vperm.xlu0 %1701, %v333_v43   ;;  %392 = vperm.xlu1 %1702, %v334_v44  }
  0x27   : > { %553 = vmatpush.bf16.msra.mxu0 %v1599_v45  ;;  %1680 = vmatpush.bf16.msra.mxu2 %v1599_v45 }
  0x28   : > { %602 = vmatpush.bf16.msra.mxu1 %v1603_v47  ;;  %1688 = vmatpush.bf16.msra.mxu3 %v1603_v47 }
  0x29   : > { %397 = vperm.xlu2 %1703, %v335_v61  }
  0x2b   : > { %554 = vmatpush.bf16.msra.mxu0 %v1591_v52  ;;  %1681 = vmatpush.bf16.msra.mxu2 %v1591_v52 }
  0x2c   : > { %603 = vmatpush.bf16.msra.mxu1 %v1595_v53  ;;  %1689 = vmatpush.bf16.msra.mxu3 %v1595_v53 }
  0x2d   : > { %402 = vperm.xlu0 %1701, %v336_v58   ;;  %407 = vperm.xlu1 %1702, %v337_v59  }
  0x2f   : > { %555 = vmatpush.bf16.msra.mxu0 %v1583_v60  ;;  %1682 = vmatpush.bf16.msra.mxu2 %v1583_v60 }
  0x30   : > { %604 = vmatpush.bf16.msra.mxu1 %v1587_v62  ;;  %1690 = vmatpush.bf16.msra.mxu3 %v1587_v62 }
  0x31   : > { %412 = vperm.xlu2 %1703, %v338_v3  }
  0x32   : > { %556 = vmatmul.bf16.vlgmr.msra.gmra.mxu0 %v1667_v63  ;;  %581 = vmatmul.bf16.vlgmr.msra.gmra.mxu2 %v1672_v0 }
  0x33   : > { %605 = vmatmul.bf16.vlgmr.msra.gmra.mxu1 %v1667_v63  ;;  %630 = vmatmul.bf16.vlgmr.msra.gmra.mxu3 %v1672_v0 }
  0x35   : > { %417 = vperm.xlu0 %1701, %v339_v1   ;;  %1177 = vperm.xlu1 %1702, %v1151_v2  }
  0x39   : > { %1167 = vperm.xlu2 %1703, %v1149_v6  }
  0x3d   : > { %1172 = vperm.xlu0 %1701, %v1150_v4   ;;  %1192 = vperm.xlu1 %1702, %v1154_v5  }
  0x41   : > { %1187 = vperm.xlu2 %1703, %v1153_v11  }
  0x42   : > { %561 = vmatmul.bf16.gmra.mxu0 %v1668_v7  ;;  %586 = vmatmul.bf16.gmra.mxu2 %v1673_v8 }
  0x43   : > { %610 = vmatmul.bf16.gmra.mxu1 %v1668_v7  ;;  %635 = vmatmul.bf16.gmra.mxu3 %v1673_v8 }
  0x45   : > { %1182 = vperm.xlu0 %1701, %v1152_v9   ;;  %1207 = vperm.xlu1 %1702, %v1157_v10  }
  0x49   : > { %1202 = vperm.xlu2 %1703, %v1156_v13  }
  0x4d   : > { %1197 = vperm.xlu0 %1701, %v1155_v12  }
  0x52   : > { %566 = vmatmul.bf16.gmra.mxu0 %v1669_v14  ;;  %591 = vmatmul.bf16.gmra.mxu2 %v1674_v15 }
  0x53   : > { %615 = vmatmul.bf16.gmra.mxu1 %v1669_v14  ;;  %640 = vmatmul.bf16.gmra.mxu3 %v1674_v15 }
  0x55   : > { %1212 = vperm.xlu0 %1701, %v1158_v16  }
  0x62   : > { %571 = vmatmul.bf16.gmra.mxu0 %v1670_v17 }
  0x63   : > { %620 = vmatmul.bf16.gmra.mxu1 %v1670_v17 }
  0x69   : > { %v1946_v21 = vpop.permute.xlu2 %362 }
  0x72   : > { %576 = vmatmul.bf16.gmra.mxu0 %v1671_v18 }
  0x73   : > { %625 = vmatmul.bf16.gmra.mxu1 %v1671_v18  ;;  %v1948_v24 = vpop.permute.xlu2 %367 }
  0x7b   : > { %v1960_v32 = vpop.permute.xlu2 %382 }
  0x7f   : > { %v353_v19 = vpop.permute.xlu1 %352  ;;  %v343_v20 = vpop.permute.xlu0 %342 }
  0x83   : > { %v398_v46 = vpop.permute.xlu2 %397 }
  0x87   : > { %v358_v22 = vpop.permute.xlu1 %357  ;;  %v348_v23 = vpop.permute.xlu0 %347 }
  0x8b   : > { %v413_v11 = vpop.permute.xlu2 %412 }
  0x8f   : > { %v1950_v25 = vpop.permute.xlu1 %377  ;;  %v1956_v30 = vpop.permute.xlu0 %372 }
  0x97   : > { %v393_v33 = vpop.permute.xlu1 %392  ;;  %v1974_v44 = vpop.permute.xlu0 %387 }
  0x9f   : > { %v403_v57 = vpop.permute.xlu0 %402  ;;  %v408_v3 = vpop.permute.xlu1 %407 }
  0xaf   : > { %v557_v26 = vpop.f32.mrf.mxu0 }
  0xb0   : > { %v1952_v27 = vadd.f32 %v557_v26, %v343_v20  ;;  %v606_v28 = vpop.f32.mrf.mxu1 }
  0xb1   : > { %v1954_v29 = vadd.f32 %v606_v28, %v343_v20 }
  0xb3   : > { %v646_v31 = vadd.f32 %v1954_v29, %v1952_v27 }
  0xb5   : > { %647 = vadd.xlane.f32.xlu1 %v646_v31  ;;  %v582_v34 = vpop.f32.mrf.mxu2 }
  0xb6   : > { %v1962_v35 = vadd.f32 %v582_v34, %v393_v33  ;;  %v631_v36 = vpop.f32.mrf.mxu3 }
  0xb7   : > { %v1964_v37 = vadd.f32 %v631_v36, %v393_v33  ;;  %v559_v38 = vpop.f32.mrf.mxu0 }
  0xb8   : > { %v1966_v39 = vadd.f32 %v559_v38, %v348_v23  ;;  %v608_v40 = vpop.f32.mrf.mxu1 }
  0xb9   : > { %v1968_v41 = vadd.f32 %v608_v40, %v348_v23  ;;  %v676_v42 = vadd.f32 %v1964_v37, %v1962_v35  ;;  %v418_v23 = vpop.permute.xlu0 %417 }
  0xbb   : > { %v649_v43 = vadd.f32 %v1968_v41, %v1966_v39 }
  0xbd   : > { %650 = vadd.xlane.f32.xlu2 %v649_v43  ;;  %677 = vadd.xlane.f32.xlu1 %v676_v42  ;;  %v584_v45 = vpop.f32.mrf.mxu2 }
  0xbe   : > { %v633_v47 = vpop.f32.mrf.mxu3  ;;  %v1976_v48 = vadd.f32 %v584_v45, %v398_v46 }
  0xbf   : > { %v1978_v49 = vadd.f32 %v633_v47, %v398_v46  ;;  %v562_v50 = vpop.f32.mrf.mxu0 }
  0xc0   : > { %v1980_v51 = vadd.f32 %v562_v50, %v353_v19  ;;  %v611_v52 = vpop.f32.mrf.mxu1 }
  0xc1   : > { %v1982_v53 = vadd.f32 %v611_v52, %v353_v19  ;;  %v679_v55 = vadd.f32 %v1978_v49, %v1976_v48 }
  0xc3   : > { %v652_v54 = vadd.f32 %v1982_v53, %v1980_v51 }
  0xc5   : > { %653 = vadd.xlane.f32.xlu0 %v652_v54  ;;  %680 = vadd.xlane.f32.xlu2 %v679_v55  ;;  %v587_v56 = vpop.f32.mrf.mxu2 }
  0xc6   : > { %v636_v58 = vpop.f32.mrf.mxu3  ;;  %v1988_v59 = vadd.f32 %v587_v56, %v403_v57 }
  0xc7   : > { %v1990_v60 = vadd.f32 %v636_v58, %v403_v57  ;;  %v564_v61 = vpop.f32.mrf.mxu0 }
  0xc8   : > { %v1992_v62 = vadd.f32 %v564_v61, %v358_v22  ;;  %v613_v63 = vpop.f32.mrf.mxu1 }
  0xc9   : > { %v1994_v0 = vadd.f32 %v613_v63, %v358_v22  ;;  %v682_v1 = vadd.f32 %v1990_v60, %v1988_v59 }
  0xcb   : > { %v655_v2 = vadd.f32 %v1994_v0, %v1992_v62 }
  0xcd   : > { %683 = vadd.xlane.f32.xlu0 %v682_v1  ;;  %656 = vadd.xlane.f32.xlu2 %v655_v2  ;;  %v589_v4 = vpop.f32.mrf.mxu2 }
  0xce   : > { %v2000_v5 = vadd.f32 %v589_v4, %v408_v3  ;;  %v638_v6 = vpop.f32.mrf.mxu3  ;;  %v2072_v4 = vpop.permute.xlu1 %1177 }
  0xcf   : > { %v2002_v7 = vadd.f32 %v638_v6, %v408_v3  ;;  %v567_v8 = vpop.f32.mrf.mxu0  ;;  %v1159_v3 = vld [vmem:[%s2826_s3 + $0x50] sm:$0xff]  ;;  %v1755_v6 = vmov 256.0  }
  0xd0   : > { %v616_v9 = vpop.f32.mrf.mxu1  ;;  %v2007_v12 = vadd.f32 %v567_v8, %v1946_v21  ;;  %1704 = vrcp.f32 %v1755_v6  ;;  %v2077_v8 = vpop.permute.xlu0 %1172 }
  0xd1   : > { %v685_v10 = vadd.f32 %v2002_v7, %v2000_v5  ;;  %v2010_v13 = vadd.f32 %v616_v9, %v1946_v21 }
  0xd3   : > { %686 = vadd.xlane.f32.xlu1 %v685_v10  ;;  %v658_v22 = vadd.f32 %v2010_v13, %v2007_v12  ;;  %v2079_v10 = vpop.permute.xlu2 %1167 }
  0xd5   : > { %v592_v14 = vpop.f32.mrf.mxu2 }
  0xd6   : > { %v2012_v15 = vadd.f32 %v592_v14, %v413_v11  ;;  %v641_v16 = vpop.f32.mrf.mxu3  ;;  %v1705_v9 = vpop.eup %1704 }
  0xd7   : > { %v2014_v17 = vadd.f32 %v641_v16, %v413_v11  ;;  %v569_v18 = vpop.f32.mrf.mxu0  ;;  %v2081_v11 = vpop.permute.xlu1 %1192  ;;  %v695_v14 = vmul.f32 256.0, %v1705_v9  ;;  %vm699_vm0 = vweird.f32 %v1705_v9 }
  0xd8   : > { %v618_v19 = vpop.f32.mrf.mxu1  ;;  %v2021_v21 = vadd.f32 %v569_v18, %v1948_v24  ;;  %v2083_v18 = vpop.permute.xlu0 %1182 }
  0xd9   : > { %v688_v20 = vadd.f32 %v2014_v17, %v2012_v15  ;;  %v2024_v26 = vadd.f32 %v618_v19, %v1948_v24  ;;  %v696_v16 = vsub.f32 1.0, %v695_v14 }
  0xdb   : > { %689 = vadd.xlane.f32.xlu2 %v688_v20  ;;  %659 = vadd.xlane.f32.xlu1 %v658_v22  ;;  %v661_v42 = vadd.f32 %v2024_v26, %v2021_v21  ;;  %v2085_v19 = vpop.permute.xlu2 %1187  ;;  %v697_v20 = vmul.f32 %v1705_v9, %v696_v16 }
  0xdd   : > { %v594_v28 = vpop.f32.mrf.mxu2 }
  0xde   : > { %v2026_v31 = vadd.f32 %v594_v28, %v418_v23  ;;  %v643_v33 = vpop.f32.mrf.mxu3 }
  0xdf   : > { %v2028_v34 = vadd.f32 %v643_v33, %v418_v23  ;;  %v572_v36 = vpop.f32.mrf.mxu0  ;;  %v2087_v22 = vpop.permute.xlu1 %1207  ;;  %v698_v23 = vadd.f32 %v1705_v9, %v697_v20 }
  0xe0   : > { %v621_v38 = vpop.f32.mrf.mxu1  ;;  %v2035_v43 = vadd.f32 %v572_v36, %v1956_v30  ;;  %2852 = vst [vmem:[#allocation2_spill] sm:$0xff] %v2087_v22  ;;  %v2089_v28 = vpop.permute.xlu0 %1197 }
  0xe1   : > { %v691_v40 = vadd.f32 %v2028_v34, %v2026_v31  ;;  %v2038_v24 = vadd.f32 %v621_v38, %v1956_v30  ;;  %2853 = vst [vmem:[#allocation3_spill] sm:$0xff] %v2089_v28  ;;  %v2091_v33 = vsel %vm699_vm0, %v1705_v9, %v698_v23 }
  0xe3   : > { %692 = vadd.xlane.f32.xlu0 %v691_v40  ;;  %662 = vadd.xlane.f32.xlu2 %v661_v42  ;;  %v664_v52 = vadd.f32 %v2038_v24, %v2035_v43  ;;  %v2093_v36 = vpop.permute.xlu2 %1202 }
  0xe4   : > { %2854 = vst [vmem:[#allocation4_spill] sm:$0xff] %v2093_v36 }
  0xe7   : > { %v574_v45 = vpop.f32.mrf.mxu0 }
  0xe8   : > { %v2041_v46 = vadd.f32 %v574_v45, %v1950_v25  ;;  %v623_v47 = vpop.f32.mrf.mxu1 }
  0xe9   : > { %v2044_v50 = vadd.f32 %v623_v47, %v1950_v25 }
  0xeb   : > { %665 = vadd.xlane.f32.xlu0 %v664_v52  ;;  %v667_v54 = vadd.f32 %v2044_v50, %v2041_v46 }
  0xed   : > { %668 = vadd.xlane.f32.xlu1 %v667_v54  ;;  %v2106_v54 = vpop.permute.xlu0 %1212 }
  0xee   : > { %2855 = vst [vmem:[#allocation5_spill] sm:$0xff] %v2106_v54 }
  0xef   : > { %v577_v55 = vpop.f32.mrf.mxu0 }
  0xf0   : > { %v2051_v30 = vadd.f32 %v577_v55, %v1960_v32  ;;  %v626_v56 = vpop.f32.mrf.mxu1 }
  0xf1   : > { %v2054_v57 = vadd.f32 %v626_v56, %v1960_v32  ;;  %v1160_v32 = vld [vmem:[%s2826_s3 + $0x58] sm:$0xff] }
  0xf3   : > { %v670_v25 = vadd.f32 %v2054_v57, %v2051_v30 }
  0xf5   : > { %671 = vadd.xlane.f32.xlu2 %v670_v25 }
  0xf7   : > { %v579_v58 = vpop.f32.mrf.mxu0 }
  0xf8   : > { %v2059_v61 = vadd.f32 %v579_v58, %v1974_v44  ;;  %v628_v63 = vpop.f32.mrf.mxu1 }
  0xf9   : > { %v2062_v1 = vadd.f32 %v628_v63, %v1974_v44  ;;  %v1161_v44 = vld [vmem:[%s2826_s3 + $0x60] sm:$0xff] }
  0xfb   : > { %v673_v2 = vadd.f32 %v2062_v1, %v2059_v61 }
  0xfd   : > { %674 = vadd.xlane.f32.xlu0 %v673_v2 }
 0x106   : > { %1222 = vperm.xlu1 %1702, %v1160_v32  }
 0x10d   : > { %1217 = vperm.xlu2 %1703, %v1159_v3  }
 0x111   : > { %1227 = vperm.xlu0 %1701, %v1161_v44  }
 0x128   : > { %v648_v38 = vpop.xlane.xlu1 %647 }
 0x129   : > { %v701_v40 = vmul.f32 %v2091_v33, %v648_v38 }
 0x12b   : > { %v2097_v42 = vsub.f32 %v1952_v27, %v701_v40  ;;  %v2100_v45 = vsub.f32 %v1954_v29, %v701_v40 }
 0x12d   : > { %v749_v47 = vmul.f32 %v2097_v42, %v2097_v42  ;;  %v750_v52 = vmul.f32 %v2100_v45, %v2100_v45 }
 0x12f   : > { %v781_v55 = vadd.f32 %v750_v52, %v749_v47 }
 0x130   : > { %v651_v56 = vpop.xlane.xlu2 %650  ;;  %v678_v25 = vpop.xlane.xlu1 %677 }
 0x131   : > { %v711_v58 = vmul.f32 %v2091_v33, %v678_v25  ;;  %782 = vadd.xlane.f32.xlu1 %v781_v55  ;;  %v702_v27 = vmul.f32 %v2091_v33, %v651_v56 }
 0x133   : > { %v2111_v63 = vsub.f32 %v1962_v35, %v711_v58  ;;  %v2114_v29 = vsub.f32 %v1964_v37, %v711_v58  ;;  %v2121_v3 = vsub.f32 %v1966_v39, %v702_v27  ;;  %v2124_v6 = vsub.f32 %v1968_v41, %v702_v27 }
 0x135   : > { %v769_v2 = vmul.f32 %v2111_v63, %v2111_v63  ;;  %v770_v32 = vmul.f32 %v2114_v29, %v2114_v29  ;;  %v751_v39 = vmul.f32 %v2121_v3, %v2121_v3  ;;  %v752_v41 = vmul.f32 %v2124_v6, %v2124_v6 }
 0x137   : > { %v811_v44 = vadd.f32 %v770_v32, %v769_v2  ;;  %v784_v47 = vadd.f32 %v752_v41, %v751_v39 }
 0x138   : > { %v654_v9 = vpop.xlane.xlu0 %653  ;;  %v681_v14 = vpop.xlane.xlu2 %680 }
 0x139   : > { %v712_v35 = vmul.f32 %v2091_v33, %v681_v14  ;;  %812 = vadd.xlane.f32.xlu2 %v811_v44  ;;  %v703_v37 = vmul.f32 %v2091_v33, %v654_v9 }
 0x13b   : > { %v2129_v16 = vsub.f32 %v1976_v48, %v712_v35  ;;  %v2132_v20 = vsub.f32 %v1978_v49, %v712_v35  ;;  %v2143_v40 = vsub.f32 %v1980_v51, %v703_v37  ;;  %v2146_v48 = vsub.f32 %v1982_v53, %v703_v37 }
 0x13d   : > { %v771_v23 = vmul.f32 %v2129_v16, %v2129_v16  ;;  %v772_v38 = vmul.f32 %v2132_v20, %v2132_v20  ;;  %v753_v25 = vmul.f32 %v2143_v40, %v2143_v40  ;;  %v754_v58 = vmul.f32 %v2146_v48, %v2146_v48 }
 0x13f   : > { %v814_v49 = vadd.f32 %v772_v38, %v771_v23  ;;  %v787_v9 = vadd.f32 %v754_v58, %v753_v25 }
 0x140   : > { %v684_v52 = vpop.xlane.xlu0 %683  ;;  %v657_v55 = vpop.xlane.xlu2 %656 }
 0x141   : > { %v713_v56 = vmul.f32 %v2091_v33, %v684_v52  ;;  %815 = vadd.xlane.f32.xlu0 %v814_v49  ;;  %785 = vadd.xlane.f32.xlu2 %v784_v47  ;;  %v704_v27 = vmul.f32 %v2091_v33, %v657_v55 }
 0x143   : > { %v2154_v51 = vsub.f32 %v1988_v59, %v713_v56  ;;  %v2157_v53 = vsub.f32 %v1990_v60, %v713_v56  ;;  %v2165_v14 = vsub.f32 %v1992_v62, %v704_v27  ;;  %v2168_v35 = vsub.f32 %v1994_v0, %v704_v27 }
 0x145   : > { %v773_v2 = vmul.f32 %v2154_v51, %v2154_v51  ;;  %v774_v32 = vmul.f32 %v2157_v53, %v2157_v53  ;;  %v755_v0 = vmul.f32 %v2165_v14, %v2165_v14  ;;  %v756_v23 = vmul.f32 %v2168_v35, %v2168_v35 }
 0x146   : > { %v687_v44 = vpop.xlane.xlu1 %686 }
 0x147   : > { %v714_v59 = vmul.f32 %v2091_v33, %v687_v44  ;;  %v817_v60 = vadd.f32 %v774_v32, %v773_v2  ;;  %v790_v52 = vadd.f32 %v756_v23, %v755_v0 }
 0x149   : > { %v2172_v37 = vsub.f32 %v2000_v5, %v714_v59  ;;  %v2175_v39 = vsub.f32 %v2002_v7, %v714_v59  ;;  %788 = vadd.xlane.f32.xlu0 %v787_v9  ;;  %818 = vadd.xlane.f32.xlu1 %v817_v60 }
 0x14b   : > { %v775_v41 = vmul.f32 %v2172_v37, %v2172_v37  ;;  %v776_v62 = vmul.f32 %v2175_v39, %v2175_v39 }
 0x14d   : > { %v820_v38 = vadd.f32 %v776_v62, %v775_v41 }
 0x14e   : > { %v690_v5 = vpop.xlane.xlu2 %689  ;;  %v660_v49 = vpop.xlane.xlu1 %659 }
 0x14f   : > { %v715_v7 = vmul.f32 %v2091_v33, %v690_v5  ;;  %v705_v47 = vmul.f32 %v2091_v33, %v660_v49  ;;  %821 = vadd.xlane.f32.xlu2 %v820_v38 }
 0x151   : > { %v2188_v55 = vsub.f32 %v2012_v15, %v715_v7  ;;  %v2191_v56 = vsub.f32 %v2014_v17, %v715_v7  ;;  %v2194_v25 = vsub.f32 %v2007_v12, %v705_v47  ;;  %v2197_v58 = vsub.f32 %v2010_v13, %v705_v47  ;;  %791 = vadd.xlane.f32.xlu1 %v790_v52 }
 0x153   : > { %2856 = vst [vmem:[#allocation6_spill] sm:$0xff] %v2188_v55  ;;  %v777_v27 = vmul.f32 %v2188_v55, %v2188_v55  ;;  %v778_v2 = vmul.f32 %v2191_v56, %v2191_v56  ;;  %v757_v15 = vmul.f32 %v2194_v25, %v2194_v25  ;;  %v758_v17 = vmul.f32 %v2197_v58, %v2197_v58 }
 0x154   : > { %2857 = vst [vmem:[#allocation7_spill] sm:$0xff] %v2191_v56 }
 0x155   : > { %v823_v32 = vadd.f32 %v778_v2, %v777_v27  ;;  %v793_v44 = vadd.f32 %v758_v17, %v757_v15 }
 0x156   : > { %v693_v12 = vpop.xlane.xlu0 %692  ;;  %v663_v9 = vpop.xlane.xlu2 %662 }
 0x157   : > { %v716_v13 = vmul.f32 %v2091_v33, %v693_v12  ;;  %v706_v59 = vmul.f32 %v2091_v33, %v663_v9  ;;  %824 = vadd.xlane.f32.xlu0 %v823_v32  ;;  %794 = vadd.xlane.f32.xlu2 %v793_v44 }
 0x159   : > { %v2210_v60 = vsub.f32 %v2026_v31, %v716_v13  ;;  %v2213_v41 = vsub.f32 %v2028_v34, %v716_v13  ;;  %v2216_v62 = vsub.f32 %v2021_v21, %v706_v59  ;;  %v2219_v0 = vsub.f32 %v2024_v26, %v706_v59 }
 0x15b   : > { %2858 = vst [vmem:[#allocation8_spill] sm:$0xff] %v2210_v60  ;;  %v759_v23 = vmul.f32 %v2216_v62, %v2216_v62  ;;  %v760_v38 = vmul.f32 %v2219_v0, %v2219_v0  ;;  %v779_v5 = vmul.f32 %v2210_v60, %v2210_v60  ;;  %v780_v31 = vmul.f32 %v2213_v41, %v2213_v41 }
 0x15c   : > { %2859 = vst [vmem:[#allocation9_spill] sm:$0xff] %v2213_v41 }
 0x15d   : > { %v796_v34 = vadd.f32 %v760_v38, %v759_v23  ;;  %v826_v49 = vadd.f32 %v780_v31, %v779_v5 }
 0x15e   : > { %v666_v7 = vpop.xlane.xlu0 %665 }
 0x15f   : > { %v707_v21 = vmul.f32 %v2091_v33, %v666_v7  ;;  %797 = vadd.xlane.f32.xlu0 %v796_v34  ;;  %827 = vadd.xlane.f32.xlu1 %v826_v49 }
 0x160   : > { %v669_v26 = vpop.xlane.xlu1 %668 }
 0x161   : > { %v2231_v47 = vsub.f32 %v2035_v43, %v707_v21  ;;  %v2234_v52 = vsub.f32 %v2038_v24, %v707_v21  ;;  %v708_v27 = vmul.f32 %v2091_v33, %v669_v26  ;;  %v1162_v21 = vld [vmem:[%s2826_s3 + $0x68] sm:$0xff]  ;;  %v1163_v26 = vld [vmem:[%s2826_s3 + $0x70] sm:$0xff] }
 0x163   : > { %v2238_v2 = vsub.f32 %v2041_v46, %v708_v27  ;;  %v2241_v15 = vsub.f32 %v2044_v50, %v708_v27  ;;  %v761_v17 = vmul.f32 %v2231_v47, %v2231_v47  ;;  %v762_v32 = vmul.f32 %v2234_v52, %v2234_v52 }
 0x165   : > { %v799_v44 = vadd.f32 %v762_v32, %v761_v17  ;;  %v763_v43 = vmul.f32 %v2238_v2, %v2238_v2  ;;  %v764_v24 = vmul.f32 %v2241_v15, %v2241_v15 }
 0x167   : > { %800 = vadd.xlane.f32.xlu1 %v799_v44  ;;  %v802_v12 = vadd.f32 %v764_v24, %v763_v43 }
 0x168   : > { %v672_v46 = vpop.xlane.xlu2 %671 }
 0x169   : > { %v709_v9 = vmul.f32 %v2091_v33, %v672_v46  ;;  %803 = vadd.xlane.f32.xlu2 %v802_v12 }
 0x16b   : > { %v2253_v50 = vsub.f32 %v2051_v30, %v709_v9  ;;  %v2256_v13 = vsub.f32 %v2054_v57, %v709_v9 }
 0x16d   : > { %v765_v59 = vmul.f32 %v2253_v50, %v2253_v50  ;;  %v766_v23 = vmul.f32 %v2256_v13, %v2256_v13 }
 0x16f   : > { %v805_v38 = vadd.f32 %v766_v23, %v765_v59 }
 0x170   : > { %v675_v5 = vpop.xlane.xlu0 %674  ;;  %v2287_v17 = vpop.permute.xlu2 %1217 }
 0x171   : > { %v710_v31 = vmul.f32 %v2091_v33, %v675_v5  ;;  %806 = vadd.xlane.f32.xlu0 %v805_v38  ;;  %2863 = vst [vmem:[#allocation13_spill] sm:$0xff] %v2287_v17 }
 0x173   : > { %v2264_v34 = vsub.f32 %v2059_v61, %v710_v31  ;;  %v2267_v30 = vsub.f32 %v2062_v1, %v710_v31  ;;  %v1164_v61 = vld [vmem:[%s2826_s3 + $0x78] sm:$0xff]  ;;  %v1434_v1 = vld [vmem:[%s2828_s5] sm:$0x3] }
 0x175   : > { %2860 = vst [vmem:[#allocation10_spill] sm:$0xff] %v2264_v34  ;;  %v767_v57 = vmul.f32 %v2264_v34, %v2264_v34  ;;  %v768_v49 = vmul.f32 %v2267_v30, %v2267_v30 }
 0x176   : > { %2861 = vst [vmem:[#allocation11_spill] sm:$0xff] %v2267_v30 }
 0x177   : > { %v808_v7 = vadd.f32 %v768_v49, %v767_v57 }
 0x178   : > { %v2285_v27 = vpop.permute.xlu1 %1222 }
 0x179   : > { %809 = vadd.xlane.f32.xlu1 %v808_v7  ;;  %2862 = vst [vmem:[#allocation12_spill] sm:$0xff] %v2285_v27 }
 0x181   : > { %1232 = vperm.xlu2 %1703, %v1162_v21  }
 0x183   : > { %v2289_v44 = vpop.permute.xlu0 %1227 }
 0x184   : > { %2864 = vst [vmem:[#allocation14_spill] sm:$0xff] %v2289_v44 }
 0x185   : > { %1242 = vperm.xlu0 %1701, %v1164_v61  }
 0x189   : > { %1437 = vperm.xlu2 %1703, %v1434_v1  }
 0x192   : > { %1237 = vperm.xlu1 %1702, %v1163_v26  }
 0x1a4   : > { %v783_v32 = vpop.xlane.xlu1 %782 }
 0x1a5   : > { %v829_v43 = vmul.f32 %v783_v32, %v2091_v33 }
 0x1a7   : > { %v845_v12 = vadd.f32 1e-05, %v829_v43 }
 0x1a9   : > { %1706 = vrsqrt.f32 %v845_v12  ;;  %vm867_vm2 = vweird.f32 %v845_v12 }
 0x1ac   : > { %v813_v24 = vpop.xlane.xlu2 %812 }
 0x1ad   : > { %v839_v9 = vmul.f32 %v813_v24, %v2091_v33 }
 0x1af   : > { %v2293_v23 = vadd.f32 1e-05, %v839_v9  ;;  %v1707_v5 = vpop.eup %1706 }
 0x1b0   : > { %v862_v49 = vmul.f32 %v1707_v5, %v845_v12  ;;  %vm868_vm1 = vweird.f32 %v1707_v5 }
 0x1b1   : > { %1708 = vrsqrt.f32 %v2293_v23  ;;  %vm869_vm3 = vmor %vm867_vm2, %vm868_vm1  ;;  %vm967_vm6 = vweird.f32 %v2293_v23 }
 0x1b2   : > { %v863_v26 = vmul.f32 %v1707_v5, %v862_v49 }
 0x1b4   : > { %v816_v46 = vpop.xlane.xlu0 %815  ;;  %v786_v59 = vpop.xlane.xlu2 %785 }
 0x1b5   : > { %v840_v38 = vmul.f32 %v816_v46, %v2091_v33  ;;  %v830_v31 = vmul.f32 %v786_v59, %v2091_v33  ;;  %v864_v46 = vmul.f32 0.5, %v863_v26 }
 0x1b7   : > { %v2298_v7 = vadd.f32 1e-05, %v840_v38  ;;  %v2301_v1 = vadd.f32 1e-05, %v830_v31  ;;  %v1709_v43 = vpop.eup %1708  ;;  %v865_v31 = vsub.f32 1.5, %v864_v46 }
 0x1b8   : > { %v962_v9 = vmul.f32 %v1709_v43, %v2293_v23  ;;  %vm968_vm4 = vweird.f32 %v1709_v43 }
 0x1b9   : > { %1710 = vrsqrt.f32 %v2298_v7  ;;  %v866_v60 = vmul.f32 %v1707_v5, %v865_v31  ;;  %vm977_vm7 = vweird.f32 %v2298_v7  ;;  %vm969_vm9 = vmor %vm967_vm6, %vm968_vm4  ;;  %vm877_vm12 = vweird.f32 %v2301_v1 }
 0x1ba   : > { %1712 = vrsqrt.f32 %v2301_v1  ;;  %v963_v49 = vmul.f32 %v1709_v43, %v962_v9 }
 0x1bb   : > { %v870_v31 = vsel %vm869_vm3, %v1707_v5, %v866_v60 }
 0x1bc   : > { %v789_v57 = vpop.xlane.xlu0 %788  ;;  %v819_v61 = vpop.xlane.xlu1 %818  ;;  %v964_v55 = vmul.f32 0.5, %v963_v49 }
 0x1bd   : > { %v831_v21 = vmul.f32 %v789_v57, %v2091_v33  ;;  %v841_v41 = vmul.f32 %v819_v61, %v2091_v33 }
 0x1be   : > { %v965_v12 = vsub.f32 1.5, %v964_v55 }
 0x1bf   : > { %v2304_v32 = vadd.f32 1e-05, %v831_v21  ;;  %v2309_v59 = vpop.eup %1710  ;;  %v2327_v22 = vadd.f32 1e-05, %v841_v41  ;;  %v1021_v41 = vmul.f32 %v870_v31, %v2097_v42 }
 0x1c0   : > { %v2311_v57 = vpop.eup %1712  ;;  %v972_v27 = vmul.f32 %v2309_v59, %v2298_v7  ;;  %v966_v60 = vmul.f32 %v1709_v43, %v965_v12  ;;  %vm978_vm10 = vweird.f32 %v2309_v59 }
 0x1c1   : > { %1714 = vrsqrt.f32 %v2304_v32  ;;  %v872_v26 = vmul.f32 %v2311_v57, %v2301_v1  ;;  %vm1053_vm5 = vcmp.ge.f32.partialorder %v1021_v41, 0.0  ;;  %vm878_vm11 = vweird.f32 %v2311_v57  ;;  %vm979_vm13 = vmor %vm977_vm7, %vm978_vm10 }
 0x1c2   : > { %v822_v24 = vpop.xlane.xlu2 %821  ;;  %vm879_vm14 = vmor %vm877_vm12, %vm878_vm11  ;;  %vm887_vm0 = vweird.f32 %v2304_v32  ;;  %vm987_vm3 = vweird.f32 %v2327_v22 }
 0x1c3   : > { %v873_v54 = vmul.f32 %v2311_v57, %v872_v26  ;;  %v842_v30 = vmul.f32 %v822_v24, %v2091_v33 }
 0x1c4   : > { %v792_v38 = vpop.xlane.xlu1 %791 }
 0x1c5   : > { %v832_v44 = vmul.f32 %v792_v38, %v2091_v33  ;;  %v973_v38 = vmul.f32 %v2309_v59, %v972_v27  ;;  %v874_v36 = vmul.f32 0.5, %v873_v54  ;;  %v2336_v27 = vadd.f32 1e-05, %v842_v30 }
 0x1c6   : > { %v970_v30 = vsel %vm969_vm9, %v1709_v43, %v966_v60 }
 0x1c7   : > { %v2314_v21 = vpop.eup %1714  ;;  %v2323_v9 = vadd.f32 1e-05, %v832_v44  ;;  %v974_v44 = vmul.f32 0.5, %v973_v38  ;;  %v875_v26 = vsub.f32 1.5, %v874_v36 }
 0x1c8   : > { %v882_v46 = vmul.f32 %v2314_v21, %v2304_v32  ;;  %vm888_vm15 = vweird.f32 %v2314_v21 }
 0x1c9   : > { %1716 = vrsqrt.f32 %v2323_v9  ;;  %v975_v55 = vsub.f32 1.5, %v974_v44  ;;  %vm889_vm1 = vmor %vm887_vm0, %vm888_vm15  ;;  %vm897_vm6 = vweird.f32 %v2323_v9 }
 0x1ca   : > { %v825_v17 = vpop.xlane.xlu0 %824  ;;  %v795_v56 = vpop.xlane.xlu2 %794  ;;  %v883_v49 = vmul.f32 %v2314_v21, %v882_v46  ;;  %1718 = vrsqrt.f32 %v2327_v22 }
 0x1cb   : > { %v833_v61 = vmul.f32 %v795_v56, %v2091_v33  ;;  %v1022_v56 = vmul.f32 %v870_v31, %v2100_v45  ;;  %1720 = vrsqrt.f32 %v2336_v27  ;;  %v1085_v45 = vmul.f32 0.01, %v1021_v41 }
 0x1cc   : > { %v884_v5 = vmul.f32 0.5, %v883_v49  ;;  %v976_v12 = vmul.f32 %v2309_v59, %v975_v55  ;;  %v876_v49 = vmul.f32 %v2311_v57, %v875_v26  ;;  %v843_v60 = vmul.f32 %v825_v17, %v2091_v33 }
 0x1cd   : > { %v2339_v24 = vadd.f32 1e-05, %v833_v61  ;;  %vm1054_vm8 = vcmp.ge.f32.partialorder %v1022_v56, 0.0  ;;  %v1086_v54 = vmul.f32 0.01, %v1022_v56  ;;  %v2368_v55 = vsel %vm1053_vm5, %v1021_v41, %v1085_v45 }
 0x1ce   : > { %v885_v61 = vsub.f32 1.5, %v884_v5  ;;  %2865 = vst [vmem:[#allocation15_spill] sm:$0xff] %v2368_v55  ;;  %v880_v7 = vsel %vm879_vm14, %v2311_v57, %v876_v49 }
 0x1cf   : > { %v2343_v38 = vpop.eup %1716  ;;  %1722 = vrsqrt.f32 %v2339_v24  ;;  %v2371_v26 = vsel %vm1054_vm8, %v1022_v56, %v1086_v54  ;;  %v980_v56 = vsel %vm979_vm13, %v2309_v59, %v976_v12  ;;  %v1023_v32 = vmul.f32 %v880_v7, %v2121_v3 }
 0x1d0   : > { %v2348_v42 = vpop.eup %1718  ;;  %v892_v44 = vmul.f32 %v2343_v38, %v2323_v9  ;;  %2866 = vst [vmem:[#allocation16_spill] sm:$0xff] %v2371_v26  ;;  %v886_v41 = vmul.f32 %v2314_v21, %v885_v61  ;;  %v2414_v61 = vmul.f32 %v980_v56, %v2129_v16  ;;  %vm997_vm8 = vweird.f32 %v2336_v27 }
 0x1d1   : > { %v982_v43 = vmul.f32 %v2348_v42, %v2327_v22  ;;  %vm988_vm2 = vweird.f32 %v2348_v42  ;;  %vm1055_vm4 = vcmp.ge.f32.partialorder %v1023_v32, 0.0  ;;  %vm898_vm9 = vweird.f32 %v2343_v38 }
 0x1d2   : > { %v2331_v34 = vpop.xlane.xlu1 %827  ;;  %v798_v46 = vpop.xlane.xlu0 %797  ;;  %v893_v45 = vmul.f32 %v2343_v38, %v892_v44  ;;  %2868 = vst [vmem:[#allocation18_spill] sm:$0xff] %v2414_v61  ;;  %v1024_v44 = vmul.f32 %v880_v7, %v2124_v6  ;;  %v2439_v7 = vmul.f32 0.01, %v2414_v61  ;;  %vm899_vm11 = vmor %vm897_vm6, %vm898_vm9  ;;  %vm907_vm0 = vweird.f32 %v2339_v24 }
 0x1d3   : > { %v834_v31 = vmul.f32 %v798_v46, %v2091_v33  ;;  %v2365_v46 = vpop.eup %1720  ;;  %v983_v54 = vmul.f32 %v2348_v42, %v982_v43  ;;  %vm989_vm12 = vmor %vm987_vm3, %vm988_vm2 }
 0x1d4   : > { %v992_v59 = vmul.f32 %v2365_v46, %v2336_v27  ;;  %v894_v43 = vmul.f32 0.5, %v893_v45  ;;  %2871 = vst [vmem:[#allocation21_spill] sm:$0xff] %v2439_v7  ;;  %vm1056_vm5 = vcmp.ge.f32.partialorder %v1024_v44, 0.0  ;;  %vm998_vm13 = vweird.f32 %v2365_v46 }
 0x1d5   : > { %v2363_v5 = vadd.f32 1e-05, %v834_v31  ;;  %v2382_v17 = vpop.eup %1722  ;;  %v2385_v31 = vmul.f32 %v970_v30, %v2114_v29  ;;  %v2398_v29 = vmul.f32 %v2079_v10, %v2368_v55  ;;  %v984_v16 = vmul.f32 0.5, %v983_v54  ;;  %vm999_vm15 = vmor %vm997_vm8, %vm998_vm13 }
 0x1d6   : > { %v902_v57 = vmul.f32 %v2382_v17, %v2339_v24  ;;  %v895_v54 = vsub.f32 1.5, %v894_v43  ;;  %vm908_vm14 = vweird.f32 %v2382_v17 }
 0x1d7   : > { %2867 = vst [vmem:[#allocation17_spill] sm:$0xff] %v2385_v31  ;;  %1724 = vrsqrt.f32 %v2363_v5  ;;  %v2424_v49 = vmul.f32 0.01, %v2385_v31 }
 0x1d8   : > { %v903_v6 = vmul.f32 %v2382_v17, %v902_v57  ;;  %v985_v57 = vsub.f32 1.5, %v984_v16  ;;  %v896_v16 = vmul.f32 %v2343_v38, %v895_v54 }
 0x1d9   : > { %2870 = vst [vmem:[#allocation20_spill] sm:$0xff] %v2424_v49 }
 0x1da   : > { %v801_v36 = vpop.xlane.xlu1 %800 }
 0x1db   : > { %v835_v23 = vmul.f32 %v801_v36, %v2091_v33  ;;  %v2374_v36 = vmul.f32 %v970_v30, %v2111_v63  ;;  %v2402_v30 = vadd.f32 1e-05, %v843_v60 }
 0x1dc   : > { %v804_v28 = vpop.xlane.xlu2 %803 }
 0x1dd   : > { %v2380_v1 = vadd.f32 1e-05, %v835_v23  ;;  %v836_v63 = vmul.f32 %v804_v28, %v2091_v33  ;;  %v2406_v28 = vmul.f32 %v2079_v10, %v2371_v26  ;;  %v890_v23 = vsel %vm889_vm1, %v2314_v21, %v886_v41  ;;  %v2432_v21 = vpop.eup %1724  ;;  %vm909_vm1 = vmor %vm907_vm0, %vm908_vm14 }
 0x1de   : > { %v2421_v10 = vmul.f32 0.01, %v2374_v36  ;;  %v2428_v26 = vmul.f32 %v980_v56, %v2132_v20  ;;  %v1025_v41 = vmul.f32 %v890_v23, %v2143_v40  ;;  %v1087_v20 = vmul.f32 0.01, %v1023_v32 }
 0x1df   : > { %1726 = vrsqrt.f32 %v2380_v1  ;;  %v2418_v12 = vadd.f32 1e-05, %v836_v63  ;;  %v993_v63 = vmul.f32 %v2365_v46, %v992_v59  ;;  %v844_v56 = vmul.f32 %v2331_v34, %v2091_v33 }
 0x1e0   : > { %2869 = vst [vmem:[#allocation19_spill] sm:$0xff] %v2421_v10  ;;  %1728 = vrsqrt.f32 %v2402_v30  ;;  %v1088_v40 = vmul.f32 0.01, %v1024_v44  ;;  %v1026_v59 = vmul.f32 %v890_v23, %v2146_v48  ;;  %v1089_v7 = vmul.f32 0.01, %v1025_v41 }
 0x1e1   : > { %1730 = vrsqrt.f32 %v2418_v12  ;;  %v994_v49 = vmul.f32 0.5, %v993_v63  ;;  %v904_v34 = vmul.f32 0.5, %v903_v6  ;;  %v2455_v61 = vsel %vm1055_vm4, %v1023_v32, %v1087_v20 }
 0x1e2   : > { %vm1057_vm7 = vcmp.ge.f32.partialorder %v1025_v41, 0.0  ;;  %v2458_v43 = vadd.f32 1e-05, %v844_v56  ;;  %v2463_v23 = vsel %vm1056_vm5, %v1024_v44, %v1088_v40  ;;  %vm1058_vm10 = vcmp.ge.f32.partialorder %v1026_v59, 0.0 }
 0x1e3   : > { %2872 = vst [vmem:[#allocation22_spill] sm:$0xff] %v2463_v23  ;;  %v1090_v32 = vmul.f32 0.01, %v1026_v59  ;;  %v986_v63 = vmul.f32 %v2348_v42, %v985_v57  ;;  %v2472_v20 = vsel %vm1057_vm7, %v1025_v41, %v1089_v7  ;;  %v995_v56 = vsub.f32 1.5, %v994_v49 }
 0x1e4   : > { %v807_v60 = vpop.xlane.xlu0 %806  ;;  %2873 = vst [vmem:[#allocation23_spill] sm:$0xff] %v2472_v20  ;;  %v905_v40 = vsub.f32 1.5, %v904_v34  ;;  %v2477_v54 = vmul.f32 0.01, %v2428_v26  ;;  %v1247_v31 = vmul.f32 %v2077_v8, %v2455_v61  ;;  %v1248_v49 = vmul.f32 %v2077_v8, %v2463_v23 }
 0x1e5   : > { %v837_v3 = vmul.f32 %v807_v60, %v2091_v33  ;;  %v2445_v45 = vpop.eup %1726  ;;  %v912_v60 = vmul.f32 %v2432_v21, %v2363_v5  ;;  %v900_v41 = vsel %vm899_vm11, %v2343_v38, %v896_v16  ;;  %v2496_v7 = vsel %vm1058_vm10, %v1026_v59, %v1090_v32 }
 0x1e6   : > { %v2453_v10 = vpop.eup %1728  ;;  %v922_v48 = vmul.f32 %v2445_v45, %v2380_v1  ;;  %v990_v8 = vsel %vm989_vm12, %v2348_v42, %v986_v63  ;;  %v996_v22 = vmul.f32 %v2365_v46, %v995_v56  ;;  %v906_v38 = vmul.f32 %v2382_v17, %v905_v40 }
 0x1e7   : > { %v2450_v55 = vadd.f32 1e-05, %v837_v3  ;;  %v2468_v3 = vpop.eup %1730  ;;  %v913_v6 = vmul.f32 %v2432_v21, %v912_v60  ;;  %v1002_v44 = vmul.f32 %v2453_v10, %v2402_v30  ;;  %v1249_v60 = vmul.f32 %v2072_v4, %v2472_v20 }
 0x1e8   : > { %v923_v57 = vmul.f32 %v2445_v45, %v922_v48  ;;  %v932_v9 = vmul.f32 %v2468_v3, %v2418_v12  ;;  %v1277_v16 = vadd.f32 %v1247_v31, %v2398_v29  ;;  %v1027_v59 = vmul.f32 %v900_v41, %v2165_v14 }
 0x1e9   : > { %1732 = vrsqrt.f32 %v2450_v55  ;;  %v914_v34 = vmul.f32 0.5, %v913_v6  ;;  %v1003_v23 = vmul.f32 %v2453_v10, %v1002_v44  ;;  %v1028_v32 = vmul.f32 %v900_v41, %v2168_v35 }
 0x1ea   : > { %1734 = vrsqrt.f32 %v2458_v43  ;;  %v924_v20 = vmul.f32 0.5, %v923_v57  ;;  %v1298_v42 = vadd.f32 %v1248_v49, %v2406_v28  ;;  %v933_v63 = vmul.f32 %v2468_v3, %v932_v9 }
 0x1eb   : > { %v1250_v14 = vmul.f32 %v2072_v4, %v2496_v7  ;;  %v2524_v35 = vmul.f32 %v990_v8, %v2154_v51  ;;  %v2527_v29 = vmul.f32 %v990_v8, %v2157_v53  ;;  %v915_v27 = vsub.f32 1.5, %v914_v34 }
 0x1ec   : > { %v1278_v28 = vadd.f32 %v1277_v16, %v1249_v60  ;;  %v1004_v24 = vmul.f32 0.5, %v1003_v23  ;;  %v910_v56 = vsel %vm909_vm1, %v2382_v17, %v906_v38  ;;  %v1000_v44 = vsel %vm999_vm15, %v2365_v46, %v996_v22  ;;  %v810_v41 = vpop.xlane.xlu1 %809 }
 0x1ed   : > { %vm1059_vm2 = vcmp.ge.f32.partialorder %v1027_v59, 0.0  ;;  %vm1060_vm3 = vcmp.ge.f32.partialorder %v1028_v32, 0.0  ;;  %v925_v40 = vsub.f32 1.5, %v924_v20  ;;  %v1091_v4 = vmul.f32 0.01, %v1027_v59 }
 0x1ee   : > { %v1092_v49 = vmul.f32 0.01, %v1028_v32  ;;  %v934_v53 = vmul.f32 0.5, %v933_v63  ;;  %v1029_v9 = vmul.f32 %v910_v56, %v2194_v25  ;;  %v1030_v23 = vmul.f32 %v910_v56, %v2197_v58 }
 0x1ef   : > { %v2501_v48 = vpop.eup %1732  ;;  %v916_v17 = vmul.f32 %v2432_v21, %v915_v27  ;;  %vm918_vm4 = vweird.f32 %v2432_v21  ;;  %v1299_v46 = vadd.f32 %v1298_v42, %v1250_v14  ;;  %vm917_vm5 = vweird.f32 %v2363_v5 }
 0x1f0   : > { %v942_v6 = vmul.f32 %v2501_v48, %v2450_v55  ;;  %v2519_v31 = vpop.eup %1734  ;;  %vm927_vm6 = vweird.f32 %v2380_v1  ;;  %v926_v60 = vmul.f32 %v2445_v45, %v925_v40  ;;  %vm928_vm7 = vweird.f32 %v2445_v45  ;;  %vm919_vm8 = vmor %vm917_vm5, %vm918_vm4 }
 0x1f1   : > { %v1012_v51 = vmul.f32 %v2519_v31, %v2458_v43  ;;  %v2543_v8 = vmul.f32 %v1000_v44, %v2172_v37  ;;  %v838_v25 = vmul.f32 %v810_v41, %v2091_v33  ;;  %v2547_v58 = vsel %vm1059_vm2, %v1027_v59, %v1091_v4  ;;  %vm929_vm11 = vmor %vm927_vm6, %vm928_vm7 }
 0x1f2   : > { %v943_v57 = vmul.f32 %v2501_v48, %v942_v6  ;;  %v2550_v34 = vsel %vm1060_vm3, %v1028_v32, %v1092_v49  ;;  %v935_v22 = vsub.f32 1.5, %v934_v53  ;;  %v1005_v38 = vsub.f32 1.5, %v1004_v24 }
 0x1f3   : > { %v1013_v5 = vmul.f32 %v2519_v31, %v1012_v51  ;;  %v1093_v16 = vmul.f32 0.01, %v1029_v9  ;;  %v1094_v42 = vmul.f32 0.01, %v1030_v23  ;;  %v920_v63 = vsel %vm919_vm8, %v2432_v21, %v916_v17 }
 0x1f4   : > { %v944_v20 = vmul.f32 0.5, %v943_v57  ;;  %vm1061_vm9 = vcmp.ge.f32.partialorder %v1029_v9, 0.0  ;;  %vm1062_vm10 = vcmp.ge.f32.partialorder %v1030_v23, 0.0  ;;  %v2556_v37 = vadd.f32 1e-05, %v838_v25 }
 0x1f5   : > { %v1251_v59 = vmul.f32 %v2083_v18, %v2547_v58  ;;  %v1252_v32 = vmul.f32 %v2083_v18, %v2550_v34  ;;  %v930_v6 = vsel %vm929_vm11, %v2445_v45, %v926_v60  ;;  %vm937_vm12 = vweird.f32 %v2418_v12 }
 0x1f6   : > { %v945_v33 = vsub.f32 1.5, %v944_v20  ;;  %v1031_v21 = vmul.f32 %v920_v63, %v2216_v62  ;;  %v1014_v14 = vmul.f32 0.5, %v1013_v5  ;;  %v936_v27 = vmul.f32 %v2468_v3, %v935_v22 }
 0x1f7   : > { %vm938_vm13 = vweird.f32 %v2468_v3  ;;  %v2567_v1 = vsel %vm1061_vm9, %v1029_v9, %v1093_v16  ;;  %v2569_v24 = vsel %vm1062_vm10, %v1030_v23, %v1094_v42  ;;  %v1032_v56 = vmul.f32 %v920_v63, %v2219_v0  ;;  %v2875_v63 = vld [vmem:[#allocation3_spill] sm:$0xff] }
 0x1f8   : > { %1736 = vrsqrt.f32 %v2556_v37  ;;  %v1033_v18 = vmul.f32 %v930_v6, %v2231_v47  ;;  %v1034_v45 = vmul.f32 %v930_v6, %v2234_v52  ;;  %v946_v40 = vmul.f32 %v2501_v48, %v945_v33  ;;  %vm939_vm15 = vmor %vm937_vm12, %vm938_vm13 }
 0x1f9   : > { %vm948_vm14 = vweird.f32 %v2501_v48  ;;  %v1279_v62 = vadd.f32 %v1278_v28, %v1251_v59  ;;  %v1300_v57 = vadd.f32 %v1299_v46, %v1252_v32  ;;  %v2578_v4 = vmul.f32 %v2453_v10, %v1005_v38 }
 0x1fa   : > { %v2583_v0 = vmul.f32 %v1000_v44, %v2175_v39  ;;  %v1095_v49 = vmul.f32 0.01, %v1031_v21  ;;  %v1015_v51 = vsub.f32 1.5, %v1014_v14  ;;  %v940_v47 = vsel %vm939_vm15, %v2468_v3, %v936_v27  ;;  %v2876_v14 = vld [vmem:[#allocation18_spill] sm:$0xff] }
 0x1fb   : > { %vm947_vm0 = vweird.f32 %v2450_v55  ;;  %v1253_v52 = vmul.f32 %v2085_v19, %v2567_v1  ;;  %v1254_v28 = vmul.f32 %v2085_v19, %v2569_v24  ;;  %vm1063_vm1 = vcmp.ge.f32.partialorder %v1031_v21, 0.0 }
 0x1fc   : > { %v1096_v53 = vmul.f32 0.01, %v1032_v56  ;;  %vm949_vm2 = vmor %vm947_vm0, %vm948_vm14  ;;  %vm1064_vm3 = vcmp.ge.f32.partialorder %v1032_v56, 0.0  ;;  %v1097_v12 = vmul.f32 0.01, %v1033_v18  ;;  %vm1018_vm4 = vweird.f32 %v2519_v31 }
 0x1fd   : > { %v1098_v41 = vmul.f32 0.01, %v1034_v45  ;;  %v950_v39 = vsel %vm949_vm2, %v2501_v48, %v946_v40  ;;  %vm1065_vm5 = vcmp.ge.f32.partialorder %v1033_v18, 0.0  ;;  %vm1066_vm6 = vcmp.ge.f32.partialorder %v1034_v45, 0.0 }
 0x1fe   : > { %v1737_v44 = vpop.eup %1736  ;;  %v1035_v55 = vmul.f32 %v940_v47, %v2238_v2  ;;  %v1036_v3 = vmul.f32 %v940_v47, %v2241_v15  ;;  %vm1008_vm7 = vweird.f32 %v2453_v10  ;;  %v2596_v19 = vsel %vm1063_vm1, %v1031_v21, %v1095_v49  ;;  %v2877_v47 = vld [vmem:[#allocation4_spill] sm:$0xff] }
 0x1ff   : > { %vm1079_vm8 = vcmp.ge.f32.partialorder %v2543_v8, 0.0  ;;  %v1111_v9 = vmul.f32 0.01, %v2543_v8  ;;  %v952_v23 = vmul.f32 %v1737_v44, %v2556_v37  ;;  %v2601_v48 = vsel %vm1064_vm3, %v1032_v56, %v1096_v53 }
 0x200   : > { %v1016_v17 = vmul.f32 %v2519_v31, %v1015_v51  ;;  %vm1017_vm9 = vweird.f32 %v2458_v43  ;;  %v1037_v2 = vmul.f32 %v950_v39, %v2253_v50  ;;  %v1038_v15 = vmul.f32 %v950_v39, %v2256_v13  ;;  %v2874_v50 = vld [vmem:[#allocation17_spill] sm:$0xff]  ;;  %v2878_v43 = vld [vmem:[#allocation10_spill] sm:$0xff] }
 0x201   : > { %vm1007_vm10 = vweird.f32 %v2402_v30  ;;  %v1280_v46 = vadd.f32 %v1279_v62, %v1253_v52  ;;  %v2609_v20 = vsel %vm1065_vm5, %v1033_v18, %v1097_v12  ;;  %v2612_v60 = vsel %vm1066_vm6, %v1034_v45, %v1098_v41  ;;  %v2879_v41 = vld [vmem:[#allocation11_spill] sm:$0xff] }
 0x202   : > { %v953_v25 = vmul.f32 %v1737_v44, %v952_v23  ;;  %v1301_v5 = vadd.f32 %v1300_v57, %v1254_v28  ;;  %v1255_v22 = vmul.f32 %v2081_v11, %v2596_v19  ;;  %v1099_v38 = vmul.f32 0.01, %v1035_v55 }
 0x203   : > { %v1100_v16 = vmul.f32 0.01, %v1036_v3  ;;  %vm1073_vm11 = vcmp.ge.f32.partialorder %v2374_v36, 0.0  ;;  %v1256_v13 = vmul.f32 %v2081_v11, %v2601_v48  ;;  %vm1067_vm13 = vcmp.ge.f32.partialorder %v1035_v55, 0.0 }
 0x204   : > { %vm1068_vm14 = vcmp.ge.f32.partialorder %v1036_v3, 0.0  ;;  %v954_v42 = vmul.f32 0.5, %v953_v25  ;;  %v1257_v33 = vmul.f32 %v2875_v63, %v2609_v20  ;;  %v1258_v59 = vmul.f32 %v2875_v63, %v2612_v60 }
 0x205   : > { %v1101_v32 = vmul.f32 0.01, %v1037_v2  ;;  %v1102_v6 = vmul.f32 0.01, %v1038_v15  ;;  %vm1069_vm15 = vcmp.ge.f32.partialorder %v1037_v2, 0.0  ;;  %vm1070_vm0 = vcmp.ge.f32.partialorder %v1038_v15, 0.0 }
 0x206   : > { %v955_v21 = vsub.f32 1.5, %v954_v42  ;;  %vm958_vm1 = vweird.f32 %v1737_v44  ;;  %vm1075_vm2 = vcmp.ge.f32.partialorder %v2876_v14, 0.0  ;;  %vm1076_vm3 = vcmp.ge.f32.partialorder %v2428_v26, 0.0 }
 0x207   : > { %v1281_v11 = vadd.f32 %v1280_v46, %v1255_v22  ;;  %v2626_v27 = vsel %vm1067_vm13, %v1035_v55, %v1099_v38  ;;  %v2628_v56 = vsel %vm1068_vm14, %v1036_v3, %v1100_v16  ;;  %v1112_v18 = vmul.f32 0.01, %v2583_v0  ;;  %vm1019_vm14 = vmor %vm1017_vm9, %vm1018_vm4  ;;  %v2880_v3 = vld [vmem:[#allocation2_spill] sm:$0xff]  ;;  %v2884_v38 = vld [vmem:[#allocation5_spill] sm:$0xff] }
 0x208   : > { %v1302_v45 = vadd.f32 %v1301_v5, %v1256_v13  ;;  %vm1080_vm5 = vcmp.ge.f32.partialorder %v2583_v0, 0.0  ;;  %v956_v40 = vmul.f32 %v1737_v44, %v955_v21  ;;  %vm957_vm6 = vweird.f32 %v2556_v37  ;;  %v2881_v5 = vld [vmem:[#allocation19_spill] sm:$0xff] }
 0x209   : > { %vm1077_vm12 = vcmp.ge.f32.partialorder %v2524_v35, 0.0  ;;  %v1282_v62 = vadd.f32 %v1281_v11, %v1257_v33  ;;  %v2635_v57 = vsel %vm1069_vm15, %v1037_v2, %v1101_v32  ;;  %v2638_v49 = vsel %vm1070_vm0, %v1038_v15, %v1102_v6  ;;  %vm959_vm13 = vmor %vm957_vm6, %vm958_vm1  ;;  %v2885_v33 = vld [vmem:[#allocation6_spill] sm:$0xff]  ;;  %v2886_v32 = vld [vmem:[#allocation7_spill] sm:$0xff] }
 0x20a   : > { %v2643_v51 = vsel %vm1079_vm8, %v2543_v8, %v1111_v9  ;;  %v1303_v37 = vadd.f32 %v1302_v45, %v1258_v59  ;;  %v1259_v52 = vmul.f32 %v2877_v47, %v2626_v27  ;;  %v1260_v28 = vmul.f32 %v2877_v47, %v2628_v56  ;;  %vm1009_vm8 = vmor %vm1007_vm10, %vm1008_vm7  ;;  %v2888_v11 = vld [vmem:[#allocation13_spill] sm:$0xff] }
 0x20b   : > { %v960_v53 = vsel %vm959_vm13, %v1737_v44, %v956_v40  ;;  %v2661_v8 = vsel %vm1080_vm5, %v2583_v0, %v1112_v18  ;;  %v1020_v55 = vsel %vm1019_vm14, %v2519_v31, %v1016_v17  ;;  %v1261_v9 = vmul.f32 %v2880_v3, %v2635_v57 }
 0x20c   : > { %v1039_v12 = vmul.f32 %v960_v53, %v2878_v43  ;;  %v1040_v39 = vmul.f32 %v960_v53, %v2879_v41  ;;  %v1262_v44 = vmul.f32 %v2880_v3, %v2638_v49  ;;  %v1010_v30 = vsel %vm1009_vm8, %v2453_v10, %v2578_v4  ;;  %v2882_v4 = vld [vmem:[#allocation20_spill] sm:$0xff] }
 0x20d   : > { %vm1078_vm4 = vcmp.ge.f32.partialorder %v2527_v29, 0.0  ;;  %v1109_v2 = vmul.f32 0.01, %v2524_v35  ;;  %v1110_v15 = vmul.f32 0.01, %v2527_v29  ;;  %v1283_v31 = vadd.f32 %v1282_v62, %v1259_v52  ;;  %v2890_v52 = vld [vmem:[#allocation9_spill] sm:$0xff] }
 0x20e   : > { %vm1071_vm7 = vcmp.ge.f32.partialorder %v1039_v12, 0.0  ;;  %vm1072_vm9 = vcmp.ge.f32.partialorder %v1040_v39, 0.0  ;;  %v1103_v0 = vmul.f32 0.01, %v1039_v12  ;;  %v1104_v23 = vmul.f32 0.01, %v1040_v39 }
 0x20f   : > { %v1304_v17 = vadd.f32 %v1303_v37, %v1260_v28  ;;  %v2683_v10 = vsel %vm1073_vm11, %v2374_v36, %v2881_v5  ;;  %vm2883_vm10 = vcmp.ge.f32.partialorder %v2874_v50, 0.0  ;;  %v1284_v42 = vadd.f32 %v1283_v31, %v1261_v9  ;;  %v2887_v36 = vld [vmem:[#allocation21_spill] sm:$0xff]  ;;  %v2889_v37 = vld [vmem:[#allocation8_spill] sm:$0xff]  ;;  %v1238_v31 = vpop.permute.xlu1 %1237 }
 0x210   : > { %v2675_v46 = vsel %vm1071_vm7, %v1039_v12, %v1103_v0  ;;  %v2677_v25 = vsel %vm1072_vm9, %v1040_v39, %v1104_v23  ;;  %v2689_v22 = vsel %vm2883_vm10, %v2874_v50, %v2882_v4  ;;  %v1049_v59 = vmul.f32 %v1010_v30, %v2885_v33  ;;  %v2891_v53 = vld [vmem:[#allocation12_spill] sm:$0xff]  ;;  %v1243_v4 = vpop.permute.xlu0 %1242 }
 0x211   : > { %v1263_v16 = vmul.f32 %v2884_v38, %v2675_v46  ;;  %v1264_v13 = vmul.f32 %v2884_v38, %v2677_v25  ;;  %v1305_v63 = vadd.f32 %v1304_v17, %v1262_v44  ;;  %v1050_v6 = vmul.f32 %v1010_v30, %v2886_v32 }
 0x212   : > { %v2701_v21 = vsel %vm1075_vm2, %v2876_v14, %v2887_v36  ;;  %v2707_v50 = vsel %vm1076_vm3, %v2428_v26, %v2477_v54  ;;  %v1265_v18 = vmul.f32 %v2888_v11, %v2683_v10  ;;  %v1266_v45 = vmul.f32 %v2888_v11, %v2689_v22  ;;  %v1233_v54 = vpop.permute.xlu2 %1232 }
 0x213   : > { %v1285_v40 = vadd.f32 %v1284_v42, %v1263_v16  ;;  %v1306_v62 = vadd.f32 %v1305_v63, %v1264_v13  ;;  %v1051_v47 = vmul.f32 %v1020_v55, %v2889_v37  ;;  %v1052_v28 = vmul.f32 %v1020_v55, %v2890_v52 }
 0x214   : > { %v2718_v14 = vsel %vm1077_vm12, %v2524_v35, %v1109_v2  ;;  %v2723_v26 = vsel %vm1078_vm4, %v2527_v29, %v1110_v15  ;;  %v1267_v43 = vmul.f32 %v2891_v53, %v2701_v21  ;;  %v1268_v12 = vmul.f32 %v2891_v53, %v2707_v50  ;;  %v2892_v35 = vld [vmem:[#allocation14_spill] sm:$0xff] }
 0x215   : > { %v1286_v41 = vadd.f32 %v1285_v40, %v1265_v18  ;;  %v1307_v39 = vadd.f32 %v1306_v62, %v1266_v45  ;;  %vm1081_vm11 = vcmp.ge.f32.partialorder %v1049_v59, 0.0  ;;  %vm1082_vm15 = vcmp.ge.f32.partialorder %v1050_v6, 0.0 }
 0x216   : > { %v1113_v55 = vmul.f32 0.01, %v1049_v59  ;;  %v1114_v3 = vmul.f32 0.01, %v1050_v6  ;;  %v1269_v9 = vmul.f32 %v2892_v35, %v2718_v14  ;;  %v1270_v29 = vmul.f32 %v2892_v35, %v2723_v26 }
 0x217   : > { %v1287_v44 = vadd.f32 %v1286_v41, %v1267_v43  ;;  %v1308_v30 = vadd.f32 %v1307_v39, %v1268_v12  ;;  %v1271_v0 = vmul.f32 %v1233_v54, %v2643_v51  ;;  %v1272_v23 = vmul.f32 %v1233_v54, %v2661_v8 }
 0x218   : > { %v1115_v2 = vmul.f32 0.01, %v1051_v47  ;;  %v1116_v15 = vmul.f32 0.01, %v1052_v28  ;;  %vm1083_vm12 = vcmp.ge.f32.partialorder %v1051_v47, 0.0  ;;  %vm1084_vm0 = vcmp.ge.f32.partialorder %v1052_v28, 0.0 }
 0x219   : > { %v1288_v17 = vadd.f32 %v1287_v44, %v1269_v9  ;;  %v1309_v5 = vadd.f32 %v1308_v30, %v1270_v29  ;;  %v2736_v38 = vsel %vm1081_vm11, %v1049_v59, %v1113_v55  ;;  %v2739_v16 = vsel %vm1082_vm15, %v1050_v6, %v1114_v3 }
 0x21a   : > { %v1273_v63 = vmul.f32 %v1238_v31, %v2736_v38  ;;  %v1274_v33 = vmul.f32 %v1238_v31, %v2739_v16  ;;  %v1147_v32 = vsel %vm1083_vm12, %v1051_v47, %v1115_v2  ;;  %v1148_v36 = vsel %vm1084_vm0, %v1052_v28, %v1116_v15 }
 0x21b   : > { %v1289_v13 = vadd.f32 %v1288_v17, %v1271_v0  ;;  %v1310_v42 = vadd.f32 %v1309_v5, %v1272_v23  ;;  %v1275_v11 = vmul.f32 %v1243_v4, %v1147_v32  ;;  %v1276_v18 = vmul.f32 %v1243_v4, %v1148_v36 }
 0x21c   : > { %vm1445_vm4 = vcmask 1041408  }
 0x21d   : > { %v1290_v45 = vadd.f32 %v1289_v13, %v1273_v63  ;;  %v1311_v40 = vadd.f32 %v1310_v42, %v1274_v33 }
 0x21f   : > { %v1291_v62 = vadd.f32 %v1290_v45, %v1275_v11  ;;  %v1312_v37 = vadd.f32 %v1311_v40, %v1276_v18 }
 0x221   : > { %v1292_v52 = vrot.slane %v1291_v62, 4  ;;  %v1313_v59 = vrot.slane %v1312_v37, 4 }
 0x223   : > { %v1293_v54 = vadd.f32 %v1292_v52, %v1291_v62  ;;  %v1314_v53 = vadd.f32 %v1313_v59, %v1312_v37 }
 0x225   : > { %v1294_v6 = vrot.slane %v1293_v54, 2  ;;  %v1315_v43 = vrot.slane %v1314_v53, 2 }
 0x227   : > { %v1295_v12 = vadd.f32 %v1294_v6, %v1293_v54  ;;  %v1316_v41 = vadd.f32 %v1315_v43, %v1314_v53 }
 0x229   : > { %v1296_v39 = vrot.slane %v1295_v12, 1  ;;  %v1317_v55 = vrot.slane %v1316_v41, 1 }
 0x22b   : > { %v1297_v3 = vadd.f32 %v1296_v39, %v1295_v12  ;;  %v1318_v35 = vadd.f32 %v1317_v55, %v1316_v41  ;;  %v2894_v39 = vld [vmem:[#allocation15_spill] sm:$0xff]  ;;  %v2895_v55 = vld [vmem:[#allocation16_spill] sm:$0xff] }
 0x22d   : > { %v1644_v47 = vmul.f32 -1.442695, %v1297_v3  ;;  %v1645_v28 = vmul.f32 -1.442695, %v1318_v35 }
 0x22f   : > { %1738 = vpow2.f32 %v1644_v47 }
 0x230   : > { %1740 = vpow2.f32 %v1645_v28  ;;  %v2896_v28 = vld [vmem:[#allocation23_spill] sm:$0xff] }
 0x235   : > { %v1739_v9 = vpop.eup %1738 }
 0x236   : > { %v1741_v29 = vpop.eup %1740  ;;  %v1325_v44 = vadd.f32 1.0, %v1739_v9 }
 0x237   : > { %v1326_v30 = vadd.f32 1.0, %v1741_v29 }
 0x238   : > { %1742 = vrcp.f32 %v1325_v44  ;;  %v1338_v17 = vand.u32 2147483648, %v1325_v44  ;;  %v1336_v13 = vand.u32 2147483647, %v1325_v44  ;;  %vm1332_vm3 = vweird.f32 %v1325_v44 }
 0x239   : > { %1744 = vrcp.f32 %v1326_v30  ;;  %v1353_v42 = vand.u32 2147483648, %v1326_v30  ;;  %v1351_v33 = vand.u32 2147483647, %v1326_v30  ;;  %vm1347_vm6 = vweird.f32 %v1326_v30 }
 0x23a   : > { %v1339_v18 = vor.u32 1.1754944e-38, %v1338_v17  ;;  %vm1337_vm13 = vcmp.eq.f32.partialorder %v1336_v13, 8.507059e+37 }
 0x23b   : > { %v1354_v62 = vor.u32 1.1754944e-38, %v1353_v42  ;;  %vm1352_vm8 = vcmp.eq.f32.partialorder %v1351_v33, 8.507059e+37 }
 0x23e   : > { %v1743_v0 = vpop.eup %1742 }
 0x23f   : > { %v1745_v23 = vpop.eup %1744  ;;  %v1328_v2 = vmul.f32 %v1743_v0, %v1325_v44  ;;  %vm1333_vm1 = vweird.f32 %v1743_v0 }
 0x240   : > { %v1343_v15 = vmul.f32 %v1745_v23, %v1326_v30  ;;  %vm1348_vm2 = vweird.f32 %v1745_v23  ;;  %vm1334_vm5 = vmor %vm1332_vm3, %vm1333_vm1 }
 0x241   : > { %v1329_v31 = vsub.f32 1.0, %v1328_v2  ;;  %vm1349_vm14 = vmor %vm1347_vm6, %vm1348_vm2 }
 0x242   : > { %v1344_v5 = vsub.f32 1.0, %v1343_v15 }
 0x243   : > { %v1330_v4 = vmul.f32 %v1743_v0, %v1329_v31 }
 0x244   : > { %v1345_v63 = vmul.f32 %v1745_v23, %v1344_v5 }
 0x245   : > { %v1331_v11 = vadd.f32 %v1743_v0, %v1330_v4 }
 0x246   : > { %v1346_v45 = vadd.f32 %v1745_v23, %v1345_v63 }
 0x247   : > { %v1335_v40 = vsel %vm1334_vm5, %v1743_v0, %v1331_v11 }
 0x248   : > { %v2743_v37 = vsel %vm1337_vm13, %v1339_v18, %v1335_v40  ;;  %v1350_v52 = vsel %vm1349_vm14, %v1745_v23, %v1346_v45 }
 0x249   : > { %v2745_v59 = vsel %vm1352_vm8, %v1354_v62, %v1350_v52  ;;  %v1387_v54 = vmul.f32 %v2743_v37, %v1147_v32  ;;  %v1385_v6 = vmul.f32 %v2743_v37, %v2736_v38  ;;  %v1383_v12 = vmul.f32 %v2743_v37, %v2643_v51  ;;  %v2893_v51 = vld [vmem:[#allocation22_spill] sm:$0xff] }
 0x24a   : > { %v1388_v53 = vmul.f32 %v2745_v59, %v1148_v36  ;;  %v1386_v43 = vmul.f32 %v2745_v59, %v2739_v16  ;;  %v1384_v41 = vmul.f32 %v2745_v59, %v2661_v8  ;;  %v1381_v32 = vmul.f32 %v2743_v37, %v2718_v14 }
 0x24b   : > { %1394 = vmatpush.msrb.mxu2 %v1387_v54  ;;  %v1382_v38 = vmul.f32 %v2745_v59, %v2723_v26  ;;  %v1359_v16 = vmul.f32 %v2743_v37, %v2455_v61  ;;  %v1360_v36 = vmul.f32 %v2745_v59, %v2893_v51  ;;  %v1357_v8 = vmul.f32 %v2743_v37, %v2894_v39 }
 0x24c   : > { %1414 = vmatpush.msrb.mxu3 %v1388_v53  ;;  %v1379_v14 = vmul.f32 %v2743_v37, %v2701_v21  ;;  %v1358_v3 = vmul.f32 %v2745_v59, %v2895_v55  ;;  %v1380_v26 = vmul.f32 %v2745_v59, %v2707_v50  ;;  %v1377_v61 = vmul.f32 %v2743_v37, %v2683_v10 }
 0x24d   : > { %1395 = vmatpush.msrb.mxu2 %v1385_v6  ;;  %1391 = vst [vmem:[%s286_s8 + $0x10] sm:$0xff] %v1359_v16  ;;  %v1378_v35 = vmul.f32 %v2745_v59, %v2689_v22  ;;  %v1375_v21 = vmul.f32 %v2743_v37, %v2675_v46  ;;  %v1376_v50 = vmul.f32 %v2745_v59, %v2677_v25 }
 0x24e   : > { %1415 = vmatpush.msrb.mxu3 %v1386_v43  ;;  %1392 = vst [vmem:[%s286_s8 + $0x18] sm:$0xff] %v1360_v36  ;;  %v1373_v47 = vmul.f32 %v2743_v37, %v2635_v57  ;;  %v1374_v10 = vmul.f32 %v2745_v59, %v2638_v49  ;;  %v1371_v22 = vmul.f32 %v2743_v37, %v2626_v27 }
 0x24f   : > { %1396 = vmatpush.msrb.mxu2 %v1383_v12  ;;  %1389 = vst [vmem:[%s286_s8] sm:$0xff] %v1357_v8  ;;  %v1372_v46 = vmul.f32 %v2745_v59, %v2628_v56  ;;  %v1369_v25 = vmul.f32 %v2743_v37, %v2609_v20  ;;  %v1370_v57 = vmul.f32 %v2745_v59, %v2612_v60 }
 0x250   : > { %1416 = vmatpush.msrb.mxu3 %v1384_v41  ;;  %1390 = vst [vmem:[%s286_s8 + $0x8] sm:$0xff] %v1358_v3  ;;  %v1367_v49 = vmul.f32 %v2743_v37, %v2596_v19  ;;  %v1368_v27 = vmul.f32 %v2745_v59, %v2601_v48  ;;  %v1365_v56 = vmul.f32 %v2743_v37, %v2567_v1 }
 0x251   : > { %1397 = vmatpush.msrb.mxu2 %v1381_v32  ;;  %v1366_v20 = vmul.f32 %v2745_v59, %v2569_v24  ;;  %v1363_v60 = vmul.f32 %v2743_v37, %v2547_v58  ;;  %v1364_v19 = vmul.f32 %v2745_v59, %v2550_v34  ;;  %v1361_v48 = vmul.f32 %v2743_v37, %v2896_v28  ;;  %v1393_v58 = vld [vmem:[%s2827_s4] sm:$0xff]  ;;  %v1438_v34 = vpop.permute.xlu2 %1437 }
 0x252   : > { %1417 = vmatpush.msrb.mxu3 %v1382_v38  ;;  %v1362_v1 = vmul.f32 %v2745_v59, %v2496_v7 }
 0x253   : > { %1398 = vmatpush.msrb.mxu2 %v1379_v14 }
 0x254   : > { %1418 = vmatpush.msrb.mxu3 %v1380_v26 }
 0x255   : > { %1399 = vmatpush.msrb.mxu2 %v1377_v61 }
 0x256   : > { %1419 = vmatpush.msrb.mxu3 %v1378_v35 }
 0x257   : > { %1400 = vmatpush.msrb.mxu2 %v1375_v21 }
 0x258   : > { %1420 = vmatpush.msrb.mxu3 %v1376_v50 }
 0x259   : > { %1401 = vmatpush.msrb.mxu2 %v1373_v47 }
 0x25a   : > { %1421 = vmatpush.msrb.mxu3 %v1374_v10 }
 0x25b   : > { %1402 = vmatpush.msrb.mxu2 %v1371_v22 }
 0x25c   : > { %1422 = vmatpush.msrb.mxu3 %v1372_v46 }
 0x25d   : > { %1403 = vmatpush.msrb.mxu2 %v1369_v25 }
 0x25e   : > { %1423 = vmatpush.msrb.mxu3 %v1370_v57 }
 0x25f   : > { %1404 = vmatpush.msrb.mxu2 %v1367_v49 }
 0x260   : > { %1424 = vmatpush.msrb.mxu3 %v1368_v27 }
 0x261   : > { %1405 = vmatpush.msrb.mxu2 %v1365_v56 }
 0x262   : > { %1425 = vmatpush.msrb.mxu3 %v1366_v20 }
 0x263   : > { %1406 = vmatpush.msrb.mxu2 %v1363_v60 }
 0x264   : > { %1426 = vmatpush.msrb.mxu3 %v1364_v19 }
 0x265   : > { %1407 = vmatpush.msrb.mxu2 %v1361_v48 }
 0x266   : > { %1427 = vmatpush.msrb.mxu3 %v1362_v1 }
 0x267   : > { %1408 = vmatpush.msrb.mxu2 %v1359_v16 }
 0x268   : > { %1428 = vmatpush.msrb.mxu3 %v1360_v36 }
 0x269   : > { %1409 = vmatpush.msrb.mxu2 %v1357_v8 }
 0x26a   : > { %1429 = vmatpush.msrb.mxu3 %v1358_v3  ;;  %1410 = vmatmul.f32.vlgmr.msrb.gmra.mxu2 %v1393_v58 }
 0x26b   : > { %1430 = vmatmul.f32.vlgmr.msrb.gmra.mxu3 %v1393_v58 }
 0x2ed   : > { %v1411_v24 = vpop.f32.mrf.mxu2 }
 0x2ee   : > { %v1431_v9 = vpop.f32.mrf.mxu3  ;;  %v1440_v44 = vadd.f32 %v1438_v34, %v1411_v24 }
 0x2ef   : > { %v1441_v29 = vadd.f32 %v1438_v34, %v1431_v9 }
 0x2f1   : > { %v1444_v7 = vrot.slane %v1441_v29, 6 }
 0x2f3   : > { %v1446_v30 = vsel %vm1445_vm4, %v1440_v44, %v1444_v7 }
 0x2f4   : > { %1448 = vst [vmem:[%s291_s12] sm:$0xf] %v1446_v30 }
 0x2f5 PF: > { %s18_s24 = sadd.s32 1, %s1752_s24  }
 0x2f6   : > { %p15_p4 = scmp.ge.s32.totalorder %s18_s24, 4  }
 0x2f8   :  { %17 = sbr.rel (!%p15_p4) target bundleno = 1 (0x1), region = 86 }

</bundles_post_ra>
